<compile_context>
chip_gen: v7x
topology: tpu7x:2x2x1
jax: 0.10.0
libtpu: 0.0.40
codegen_flags: <defaults>
</compile_context>

<pallas_src>
from functools import partial

import jax
import jax.numpy as jnp
from jax.experimental import pallas as pl
from jax.experimental.pallas import tpu as pltpu


def _round_up(x, m):
    return (x + m - 1) // m * m


def _pick_tile(B):
    """Pick the row/col tile minimizing row padding (prefer the larger tile)."""
    best_t, best_pad = 128, _round_up(B, 128) - B
    for t in (256,):  # 512 can help on v5e/v6e but is avoided for v7x VMEM.
        pad = _round_up(B, t) - B
        if pad <= best_pad:
            best_t, best_pad = t, pad
    return best_t


def _ntxent_kernel(xrow_ref, xcol_ref, xpartner_ref, out_ref, m_sc, s_sc, *,
                   B, B_pad, tile, n_pad_cols):
    i = pl.program_id(0)          # row tile (parallel)
    j = pl.program_id(1)          # column tile (arbitrary, online softmax)
    last_j = pl.num_programs(1) - 1

    @pl.when(j == 0)
    def _():
        m_sc[...] = jnp.full_like(m_sc, -jnp.inf)
        s_sc[...] = jnp.zeros_like(s_sc)

    # (tile, tile) logits slab: rows [i*tile, ...), cols [j*tile, ...).
    # Temperature and (for cosine) L2 normalization were folded into the rows
    # by the wrapper, so the MXU output already IS the logits.
    logits = jax.lax.dot_general(
        xrow_ref[...], xcol_ref[...], (((1,), (1,)), ((), ())),
        preferred_element_type=jnp.float32)

    # Mask only the self-similarity entries (global row == global col).
    # Padded columns are NOT masked here: padded rows are exactly zero, so
    # their logit column is exactly 0 and is removed analytically at the end.
    row_g = i * tile + jax.lax.broadcasted_iota(jnp.int32, (tile, tile), 0)
    col_g = j * tile + jax.lax.broadcasted_iota(jnp.int32, (tile, tile), 1)
    logits = jnp.where(row_g == col_g, jnp.float32(-1e30), logits)

    # Online softmax accumulation (running max + rescaled sum).
    m_prev = m_sc[...]
    m_new = jnp.maximum(m_prev, jnp.max(logits, axis=-1, keepdims=True))
    s_sc[...] = (s_sc[...] * jnp.exp(m_prev - m_new)
                 + jnp.sum(jnp.exp(logits - m_new), axis=-1, keepdims=True))
    m_sc[...] = m_new

    @pl.when(j == last_j)
    def _():
        m = m_sc[...]
        s = s_sc[...]
        if n_pad_cols:
            # Zero-padded rows appear as columns with logit exactly 0.
            s = s - jnp.float32(n_pad_cols) * jnp.exp(-m)
        s = jnp.maximum(s, jnp.float32(1e-30))
        lse = m + jnp.log(s)                                   # (tile, 1)

        # Positive logit in O(tile*D): row . partner row (same folded data the
        # MXU saw, f32 accumulation on the VPU).
        pos = jnp.sum(xrow_ref[...].astype(jnp.float32)
                      * xpartner_ref[...].astype(jnp.float32),
                      axis=-1, keepdims=True)                  # (tile, 1)

        # Exclude zero-padded rows from the loss sum.
        local = jax.lax.broadcasted_iota(jnp.int32, (tile, 1), 0)
        valid = ((i * tile) % B_pad + local) < B
        partial_loss = jnp.sum(jnp.where(valid, lse - pos, 0.0))

        # Lane-dense per-row-tile partial; wrapper reduces.
        out_ref[...] = jnp.full((1, 8, 128), partial_loss, dtype=jnp.float32)


def ntxent_loss(data_i, data_j, temperature=0.2, is_cosine=True,
                mxu_dtype=jnp.bfloat16, tile=None):
    """Pallas TPU implementation of NTXentLoss(temperature, is_cosine).forward.

    mxu_dtype: dtype fed to the MXU (default bfloat16; pass jnp.float32 for an
    exact-but-slower matmul).  Accumulation is always float32.
    """
    assert data_i.shape == data_j.shape and data_i.ndim == 2
    B, D = data_i.shape

    t = int(tile) if tile is not None else _pick_tile(B)
    D_pad = _round_up(max(D, 1), 128)
    B_pad = _round_up(B, t)
    n = 2 * B_pad
    num_tiles = n // t
    half_tiles = B_pad // t
    n_pad_cols = 2 * (B_pad - B)
    inv_sqrt_t = float(temperature) ** -0.5

    # --- hoisted preprocessing (one fused XLA pass, no in-kernel re-normalize)
    def prep(x):
        x = x.astype(jnp.float32)
        return jnp.pad(x, ((0, B_pad - B), (0, D_pad - D)))

    xcat = jnp.concatenate([prep(data_i), prep(data_j)], axis=0)   # (n, D_pad)
    if is_cosine:
        sq = jnp.sum(xcat * xcat, axis=-1, keepdims=True)
        # NOTE: clamps ||x||^2 at 1e-8 (torch clamps the norm product); only
        # differs for degenerate near-zero rows.
        xcat = xcat * (jax.lax.rsqrt(jnp.maximum(sq, jnp.float32(1e-8)))
                       * jnp.float32(inv_sqrt_t))
    else:
        xcat = xcat * jnp.float32(inv_sqrt_t)
    xhat = xcat.astype(mxu_dtype)

    # --- VMEM budget (3 double-buffered input tiles + f32 logits temporaries)
    itemsize = jnp.dtype(mxu_dtype).itemsize
    est = 3 * 2 * t * D_pad * itemsize + 6 * t * t * 4 + 4 * t * 4 + 2 * 8 * 128 * 4
    vmem_limit = int(min(56 * 1024 * 1024, max(32 * 1024 * 1024, 2 * est)))

    kernel = partial(_ntxent_kernel, B=B, B_pad=B_pad, tile=t,
                     n_pad_cols=n_pad_cols)

    partials = pl.pallas_call(
        kernel,
        out_shape=jax.ShapeDtypeStruct((num_tiles, 8, 128), jnp.float32),
        grid=(num_tiles, num_tiles),
        in_specs=[
            # Row tile of the query rows (constant across the inner axis).
            pl.BlockSpec((t, D_pad), lambda i, j: (i, 0)),
            # Column tile (keys) — streamed along the inner "arbitrary" axis.
            pl.BlockSpec((t, D_pad), lambda i, j: (j, 0)),
            # Partner rows of the row tile: block (i + B_pad/t) mod num_tiles.
            pl.BlockSpec((t, D_pad),
                         lambda i, j: ((i + half_tiles) % num_tiles, 0)),
        ],
        out_specs=pl.BlockSpec((1, 8, 128), lambda i, j: (i, 0, 0)),
        scratch_shapes=[pltpu.VMEM((t, 1), jnp.float32),   # running max
                        pltpu.VMEM((t, 1), jnp.float32)],  # running sum
        compiler_params=pltpu.CompilerParams(
            dimension_semantics=("parallel", "arbitrary"),
            vmem_limit_bytes=vmem_limit,
        ),
    )(xhat, xhat, xhat)

    return jnp.sum(partials[:, 0, 0]) / jnp.float32(2 * B)


def _ntxent_ref(data_i, data_j, temperature=0.2, is_cosine=True):
    """Pure-JAX reference mirroring the PyTorch code structure."""
    data = jnp.concatenate([data_i, data_j], axis=0).astype(jnp.float32)
    n = data.shape[0]
    B = n // 2
    dots = jnp.matmul(data, data.T, precision=jax.lax.Precision.HIGHEST)
    if is_cosine:
        norms = jnp.sqrt(jnp.sum(data * data, axis=-1))
        sim = dots / jnp.maximum(norms[:, None] * norms[None, :], 1e-8)
    else:
        sim = dots
    positive = jnp.concatenate([jnp.diagonal(sim, B), jnp.diagonal(sim, -B)])[:, None]
    row = jnp.arange(n)[:, None]
    col = jnp.arange(n)[None, :]
    neg_mask = ~((row == col) | (col == (row + B) % n))
    negative = sim[neg_mask].reshape(n, n - 2)        # row-major masked select
    logits = jnp.concatenate([positive, negative], axis=1) / temperature
    lse = jax.scipy.special.logsumexp(logits, axis=1)
    return jnp.sum(lse - logits[:, 0]) / n


if __name__ == "__main__":
    key = jax.random.PRNGKey(0)
    k1, k2, k3, k4, k5, k6 = jax.random.split(key, 6)

    # (1) cosine path, exact (f32 MXU) check
    B, D = 8, 32
    di = jax.random.normal(k1, (B, D), dtype=jnp.float32)
    dj = jax.random.normal(k2, (B, D), dtype=jnp.float32)
    out = jax.block_until_ready(
        ntxent_loss(di, dj, 0.2, True, mxu_dtype=jnp.float32))
    ref = _ntxent_ref(di, dj, 0.2, True)
    assert jnp.allclose(out, ref, rtol=1e-4, atol=1e-5), (out, ref)

    # (2) cosine path, default bf16 MXU operands (perf path), looser tolerance
    out_bf = jax.block_until_ready(ntxent_loss(di, dj, 0.2, True))
    assert jnp.allclose(out_bf, ref, rtol=5e-2, atol=5e-2), (out_bf, ref)

    # (3) row + feature padding (B not multiple of tile, D not of 128)
    B2, D2 = 6, 20
    di2 = jax.random.normal(k3, (B2, D2), dtype=jnp.float32)
    dj2 = jax.random.normal(k4, (B2, D2), dtype=jnp.float32)
    out2 = jax.block_until_ready(
        ntxent_loss(di2, dj2, 0.2, True, mxu_dtype=jnp.float32))
    ref2 = _ntxent_ref(di2, dj2, 0.2, True)
    assert jnp.allclose(out2, ref2, rtol=1e-4, atol=1e-5), (out2, ref2)

    # (4) dot-similarity path
    out3 = jax.block_until_ready(
        ntxent_loss(di, dj, 0.2, False, mxu_dtype=jnp.float32))
    ref3 = _ntxent_ref(di, dj, 0.2, False)
    assert jnp.allclose(out3, ref3, rtol=1e-4, atol=1e-4), (out3, ref3)

    # (5) multi-tile grid: several row and column tiles, partner wrap-around
    B3, D3 = 300, 140
    di3 = jax.random.normal(k5, (B3, D3), dtype=jnp.float32)
    dj3 = jax.random.normal(k6, (B3, D3), dtype=jnp.float32)
    out4 = jax.block_until_ready(
        ntxent_loss(di3, dj3, 0.2, True, mxu_dtype=jnp.float32))
    ref4 = _ntxent_ref(di3, dj3, 0.2, True)
    assert jnp.allclose(out4, ref4, rtol=1e-3, atol=1e-4), (out4, ref4)

    print("KERNEL_OK")
</pallas_src>

<mosaic_0001>
module attributes {stable_mosaic.version = 11 : i64} {
  func.func @_ntxent_kernel(%arg0: i32, %arg1: i32, %arg2: memref<128x128xf32, #tpu.memory_space<vmem>>, %arg3: memref<128x128xf32, #tpu.memory_space<vmem>>, %arg4: memref<128x128xf32, #tpu.memory_space<vmem>>, %arg5: memref<1x8x128xf32, #tpu.memory_space<vmem>>, %arg6: memref<128x1xf32, #tpu.memory_space<vmem>>, %arg7: memref<128x1xf32, #tpu.memory_space<vmem>>) attributes {dimension_semantics = [#tpu.dimension_semantics<parallel>, #tpu.dimension_semantics<arbitrary>], iteration_bounds = array<i64: 2, 2>, scalar_prefetch = 0 : i64, scratch_operands = 2 : i64, tpu.core_type = #tpu.core_type<tc>, window_params = [{transform_indices = @transform_0, window_bounds = array<i64: 128, 128>}, {transform_indices = @transform_1, window_bounds = array<i64: 128, 128>}, {transform_indices = @transform_2, window_bounds = array<i64: 128, 128>}, {transform_indices = @transform_3, window_bounds = array<i64: 1, 8, 128>}]} {
    %c0_i32 = arith.constant 0 : i32
    %0 = arith.cmpi eq, %arg1, %c0_i32 : i32
    %1 = arith.extui %0 : i1 to i32
    %c0_i32_0 = arith.constant 0 : i32
    %2 = arith.cmpi ne, %1, %c0_i32_0 : i32
    scf.if %2 {
      %cst_17 = arith.constant 0xFF800000 : f32
      %36 = vector.broadcast %cst_17 : f32 to vector<128x1xf32>
      %c0_18 = arith.constant 0 : index
      %c0_19 = arith.constant 0 : index
      %37 = vector.load %arg6[%c0_18, %c0_19] : memref<128x1xf32, #tpu.memory_space<vmem>>, vector<128x1xf32>
      tpu.vector_store %arg6[%c0_18, %c0_19], %36 {strides = array<i32>} : memref<128x1xf32, #tpu.memory_space<vmem>>, vector<128x1xf32>,
      %cst_20 = arith.constant 0.000000e+00 : f32
      %38 = vector.broadcast %cst_20 : f32 to vector<128x1xf32>
      %c0_21 = arith.constant 0 : index
      %c0_22 = arith.constant 0 : index
      %39 = vector.load %arg7[%c0_21, %c0_22] : memref<128x1xf32, #tpu.memory_space<vmem>>, vector<128x1xf32>
      tpu.vector_store %arg7[%c0_21, %c0_22], %38 {strides = array<i32>} : memref<128x1xf32, #tpu.memory_space<vmem>>, vector<128x1xf32>,
    } else {
    }
    %c0 = arith.constant 0 : index
    %c0_1 = arith.constant 0 : index
    %3 = vector.load %arg2[%c0, %c0_1] : memref<128x128xf32, #tpu.memory_space<vmem>>, vector<128x128xf32>
    %c0_2 = arith.constant 0 : index
    %c0_3 = arith.constant 0 : index
    %4 = vector.load %arg3[%c0_2, %c0_3] : memref<128x128xf32, #tpu.memory_space<vmem>>, vector<128x128xf32>
    %cst = arith.constant dense<0.000000e+00> : vector<128x128xf32>
    %5 = tpu.matmul %3, %4, %cst {dimension_numbers = #tpu.dot_dimension_numbers<[1], [1], [0], [0], [0, 0, 1, 0], [], []>} : vector<128x128xf32>, vector<128x128xf32>, vector<128x128xf32> -> vector<128x128xf32>
    %c128_i32 = arith.constant 128 : i32
    %6 = arith.muli %arg0, %c128_i32 : i32
    %7 = tpu.iota {dimensions = array<i32: 0>} : vector<128x128xi32>
    %8 = vector.broadcast %6 : i32 to vector<128x128xi32>
    %9 = arith.addi %8, %7 : vector<128x128xi32>
    %c128_i32_4 = arith.constant 128 : i32
    %10 = arith.muli %arg1, %c128_i32_4 : i32
    %11 = tpu.iota {dimensions = array<i32: 1>} : vector<128x128xi32>
    %12 = vector.broadcast %10 : i32 to vector<128x128xi32>
    %13 = arith.addi %12, %11 : vector<128x128xi32>
    %14 = arith.cmpi eq, %9, %13 : vector<128x128xi32>
    %cst_5 = arith.constant -1.000000e+30 : f32
    %15 = vector.broadcast %cst_5 : f32 to vector<128x128xf32>
    %16 = arith.select %14, %15, %5 : vector<128x128xi1>, vector<128x128xf32>
    %c0_6 = arith.constant 0 : index
    %c0_7 = arith.constant 0 : index
    %17 = vector.load %arg6[%c0_6, %c0_7] : memref<128x1xf32, #tpu.memory_space<vmem>>, vector<128x1xf32>
    %cst_8 = arith.constant dense<0xFF800000> : vector<128xf32>
    %18 = vector.multi_reduction <maximumf>, %16, %cst_8 [1] : vector<128x128xf32> to vector<128xf32>
    %19 = vector.shape_cast %18 : vector<128xf32> to vector<128x1xf32>
    %20 = arith.maximumf %17, %19 : vector<128x1xf32>
    %c0_9 = arith.constant 0 : index
    %c0_10 = arith.constant 0 : index
    %21 = vector.load %arg7[%c0_9, %c0_10] : memref<128x1xf32, #tpu.memory_space<vmem>>, vector<128x1xf32>
    %22 = arith.subf %17, %20 : vector<128x1xf32>
    %23 = math.exp %22 : vector<128x1xf32>
    %24 = arith.mulf %21, %23 : vector<128x1xf32>
    %25 = vector.broadcast %20 : vector<128x1xf32> to vector<128x128xf32>
    %26 = arith.subf %16, %25 : vector<128x128xf32>
    %27 = math.exp %26 : vector<128x128xf32>
    %cst_11 = arith.constant dense<0.000000e+00> : vector<128xf32>
    %28 = vector.multi_reduction <add>, %27, %cst_11 [1] : vector<128x128xf32> to vector<128xf32>
    %29 = vector.shape_cast %28 : vector<128xf32> to vector<128x1xf32>
    %30 = arith.addf %24, %29 : vector<128x1xf32>
    %c0_12 = arith.constant 0 : index
    %c0_13 = arith.constant 0 : index
    %31 = vector.load %arg7[%c0_12, %c0_13] : memref<128x1xf32, #tpu.memory_space<vmem>>, vector<128x1xf32>
    tpu.vector_store %arg7[%c0_12, %c0_13], %30 {strides = array<i32>} : memref<128x1xf32, #tpu.memory_space<vmem>>, vector<128x1xf32>,
    %c0_14 = arith.constant 0 : index
    %c0_15 = arith.constant 0 : index
    %32 = vector.load %arg6[%c0_14, %c0_15] : memref<128x1xf32, #tpu.memory_space<vmem>>, vector<128x1xf32>
    tpu.vector_store %arg6[%c0_14, %c0_15], %20 {strides = array<i32>} : memref<128x1xf32, #tpu.memory_space<vmem>>, vector<128x1xf32>,
    %c1_i32 = arith.constant 1 : i32
    %33 = arith.cmpi eq, %arg1, %c1_i32 : i32
    %34 = arith.extui %33 : i1 to i32
    %c0_i32_16 = arith.constant 0 : i32
    %35 = arith.cmpi ne, %34, %c0_i32_16 : i32
    scf.if %35 {
      %c0_17 = arith.constant 0 : index
      %c0_18 = arith.constant 0 : index
      %36 = vector.load %arg6[%c0_17, %c0_18] : memref<128x1xf32, #tpu.memory_space<vmem>>, vector<128x1xf32>
      %c0_19 = arith.constant 0 : index
      %c0_20 = arith.constant 0 : index
      %37 = vector.load %arg7[%c0_19, %c0_20] : memref<128x1xf32, #tpu.memory_space<vmem>>, vector<128x1xf32>
      %cst_21 = arith.constant 0.000000e+00 : f32
      %38 = vector.broadcast %cst_21 : f32 to vector<128x1xf32>
      %39 = arith.subf %38, %36 : vector<128x1xf32>
      %40 = math.exp %39 : vector<128x1xf32>
      %cst_22 = arith.constant 2.400000e+02 : f32
      %41 = vector.broadcast %cst_22 : f32 to vector<128x1xf32>
      %42 = arith.mulf %41, %40 : vector<128x1xf32>
      %43 = arith.subf %37, %42 : vector<128x1xf32>
      %cst_23 = arith.constant 1.000000e-30 : f32
      %44 = vector.broadcast %cst_23 : f32 to vector<128x1xf32>
      %45 = arith.maximumf %43, %44 : vector<128x1xf32>
      %46 = math.log %45 : vector<128x1xf32>
      %47 = arith.addf %36, %46 : vector<128x1xf32>
      %c0_24 = arith.constant 0 : index
      %c0_25 = arith.constant 0 : index
      %48 = vector.load %arg2[%c0_24, %c0_25] : memref<128x128xf32, #tpu.memory_space<vmem>>, vector<128x128xf32>
      %c0_26 = arith.constant 0 : index
      %c0_27 = arith.constant 0 : index
      %49 = vector.load %arg4[%c0_26, %c0_27] : memref<128x128xf32, #tpu.memory_space<vmem>>, vector<128x128xf32>
      %50 = arith.mulf %48, %49 : vector<128x128xf32>
      %cst_28 = arith.constant dense<0.000000e+00> : vector<128xf32>
      %51 = vector.multi_reduction <add>, %50, %cst_28 [1] : vector<128x128xf32> to vector<128xf32>
      %52 = vector.shape_cast %51 : vector<128xf32> to vector<128x1xf32>
      %53 = tpu.iota {dimensions = array<i32: 0>} : vector<128x1xi32>
      %c128_i32_29 = arith.constant 128 : i32
      %54 = arith.muli %arg0, %c128_i32_29 : i32
      %c128_i32_30 = arith.constant 128 : i32
      %c0_i32_31 = arith.constant 0 : i32
      %55 = arith.cmpi eq, %c128_i32_30, %c0_i32_31 : i32
      %c1_i32_32 = arith.constant 1 : i32
      %56 = arith.select %55, %c1_i32_32, %c128_i32_30 : i32
      %57 = arith.remsi %54, %56 : i32
      %c0_i32_33 = arith.constant 0 : i32
      %58 = arith.cmpi ne, %57, %c0_i32_33 : i32
      %c0_i32_34 = arith.constant 0 : i32
      %59 = arith.cmpi slt, %57, %c0_i32_34 : i32
      %c0_i32_35 = arith.constant 0 : i32
      %60 = arith.cmpi slt, %56, %c0_i32_35 : i32
      %61 = arith.xori %59, %60 : i1
      %62 = arith.andi %61, %58 : i1
      %63 = arith.addi %57, %56 : i32
      %64 = arith.select %62, %63, %57 : i32
      %65 = vector.broadcast %64 : i32 to vector<128x1xi32>
      %66 = arith.addi %65, %53 : vector<128x1xi32>
      %c8_i32 = arith.constant 8 : i32
      %67 = vector.broadcast %c8_i32 : i32 to vector<128x1xi32>
      %68 = arith.cmpi slt, %66, %67 : vector<128x1xi32>
      %69 = arith.subf %47, %52 : vector<128x1xf32>
      %cst_36 = arith.constant 0.000000e+00 : f32
      %70 = vector.broadcast %cst_36 : f32 to vector<128x1xf32>
      %71 = arith.select %68, %69, %70 : vector<128x1xi1>, vector<128x1xf32>
      %72 = vector.shape_cast %71 : vector<128x1xf32> to vector<1x128x1xf32>
      %cst_37 = arith.constant dense<0.000000e+00> : vector<1xf32>
      %73 = vector.multi_reduction <add>, %72, %cst_37 [1, 2] : vector<1x128x1xf32> to vector<1xf32>
      %74 = vector.shape_cast %73 : vector<1xf32> to vector<1x1x1xf32>
      %75 = vector.extract %74[0, 0, 0] : f32 from vector<1x1x1xf32>
      %76 = vector.broadcast %75 : f32 to vector<1x8x128xf32>
      %c0_38 = arith.constant 0 : index
      %c0_39 = arith.constant 0 : index
      %c0_40 = arith.constant 0 : index
      %77 = vector.load %arg5[%c0_38, %c0_39, %c0_40] : memref<1x8x128xf32, #tpu.memory_space<vmem>>, vector<1x8x128xf32>
      tpu.vector_store %arg5[%c0_38, %c0_39, %c0_40], %76 {strides = array<i32>} : memref<1x8x128xf32, #tpu.memory_space<vmem>>, vector<1x8x128xf32>,
    } else {
    }
    return
  }
  func.func @transform_0(%arg0: i32, %arg1: i32) -> (i32, i32) {
    %c0_i32 = arith.constant 0 : i32
    %c0_i32_0 = arith.constant 0 : i32
    return %arg0, %c0_i32 : i32, i32
  }
  func.func @transform_1(%arg0: i32, %arg1: i32) -> (i32, i32) {
    %c0_i32 = arith.constant 0 : i32
    %c0_i32_0 = arith.constant 0 : i32
    return %arg1, %c0_i32 : i32, i32
  }
  func.func @transform_2(%arg0: i32, %arg1: i32) -> (i32, i32) {
    %c1_i32 = arith.constant 1 : i32
    %0 = arith.addi %arg0, %c1_i32 : i32
    %c2_i32 = arith.constant 2 : i32
    %c0_i32 = arith.constant 0 : i32
    %1 = arith.cmpi eq, %c2_i32, %c0_i32 : i32
    %c1_i32_0 = arith.constant 1 : i32
    %2 = arith.select %1, %c1_i32_0, %c2_i32 : i32
    %3 = arith.remsi %0, %2 : i32
    %c0_i32_1 = arith.constant 0 : i32
    %4 = arith.cmpi ne, %3, %c0_i32_1 : i32
    %c0_i32_2 = arith.constant 0 : i32
    %5 = arith.cmpi slt, %3, %c0_i32_2 : i32
    %c0_i32_3 = arith.constant 0 : i32
    %6 = arith.cmpi slt, %2, %c0_i32_3 : i32
    %7 = arith.xori %5, %6 : i1
    %8 = arith.andi %7, %4 : i1
    %9 = arith.addi %3, %2 : i32
    %10 = arith.select %8, %9, %3 : i32
    %c0_i32_4 = arith.constant 0 : i32
    %c0_i32_5 = arith.constant 0 : i32
    return %10, %c0_i32_4 : i32, i32
  }
  func.func @transform_3(%arg0: i32, %arg1: i32) -> (i32, i32, i32) {
    %c0_i32 = arith.constant 0 : i32
    %c0_i32_0 = arith.constant 0 : i32
    %c0_i32_1 = arith.constant 0 : i32
    return %arg0, %c0_i32, %c0_i32_0 : i32, i32, i32
  }
}

</mosaic_0001>

<bundles_post_ra>
// kernel: tpu_custom_call.1
= control target key start
LH: loop header
LB: loop body
LE: loop exit
PB: predicated region body
PF: predicated region fallthrough
CT: control target
= control target key end

     0   :  { %s3288_s0 = inlined_call_operand.hbm [shape: f32[256,128], index: 0, kind: input, shape index: {}]   ;;  %s3289_s1 = inlined_call_operand.hbm [shape: f32[256,128], index: 1, kind: input, shape index: {}]   ;;  %s3290_s2 = inlined_call_operand.hbm [shape: f32[256,128], index: 2, kind: input, shape index: {}]   ;;  %s3291_s3 = inlined_call_operand.hbm [shape: f32[2,8,128], index: 3, kind: output, shape index: {}]  }
   0x1   :  { %3324 = sst [smem:[#allocation38_spill]] %s3288_s0 }
   0x2   :  { %3325 = sst [smem:[#allocation39_spill]] %s3289_s1 }
   0x3   :  { %3326 = sst [smem:[#allocation40_spill]] %s3291_s3 }
   0x4   :  { %8 = vsyncpa [#allocation5], 0 }
   0x5   :  { %10 = vsyncpa [#allocation5 + $0x1], 0 }
   0x6   :  { %11 = vsyncpa [#allocation8], 0 }
   0x7   :  { %13 = vsyncpa [#allocation8 + $0x1], 0 }
   0x8   :  { %14 = vsyncpa [#allocation6], 0 }
   0x9   :  { %16 = vsyncpa [#allocation6 + $0x1], 0  ;;  %s2214_s12 = smov 0   ;;  %s2216_s13 = smov 0  }
   0xa   :  { %s2218_s14 = smov 0   ;;  %s2220_s15 = smov 0  }
   0xb   :  { %s2222_s16 = smov 0   ;;  %s2224_s17 = smov 0  }
   0xc   :  { %s2226_s18 = smov 0   ;;  %s2228_s19 = smov 0  }
   0xd   :  { %s2230_s20 = smov 0   ;;  %s2232_s21 = smov 0  }
   0xe   :  { %s2234_s22 = smov 0   ;;  %s2236_s23 = smov 0  }
   0xf   :  { %s2238_s24 = smov 0   ;;  %s2240_s25 = smov 0  }
  0x10 LB: > { %3327 = sst [smem:[#allocation15_spill]] %s2151_s17  ;;  %s2283_s26 = sadd.s32 4294967295, %s2183_s25   ;;  %s2183_s25 = sphi %s2240_s25, %s22_s25   ;;  %s2179_s24 = sphi %s2238_s24, %s3418_s24   ;;  %s2175_s23 = sphi %s2236_s23, %s3417_s23   ;;  %s2171_s22 = sphi %s2234_s22, %s3427_s22   ;;  %s2167_s21 = sphi %s2232_s21, %s3415_s21   ;;  %s2163_s20 = sphi %s2230_s20, %s3426_s20   ;;  %s2159_s19 = sphi %s2228_s19, %s3425_s19   ;;  %s2155_s18 = sphi %s2226_s18, %s3424_s18   ;;  %s2151_s17 = sphi %s2224_s17, %s3413_s17   ;;  %s2147_s16 = sphi %s2222_s16, %s3423_s16   ;;  %s2143_s15 = sphi %s2220_s15, %s3422_s15   ;;  %s2139_s14 = sphi %s2218_s14, %s3421_s14   ;;  %s2135_s13 = sphi %s2216_s13, %s3420_s13   ;;  %s2131_s12 = sphi %s2214_s12, %s3419_s12  }
  0x11   : > { %3328 = sst [smem:[#allocation16_spill]] %s2171_s22  ;;  %s31_s27 = sadd.s32 1, %s2175_s23 }
  0x12   : > { %3329 = sst [smem:[#allocation17_spill]] %s2175_s23  ;;  %p2286_p0 = scmp.ge.s32.totalorder %s31_s27, 2 }
  0x13   : > { %3330 = sst [smem:[#allocation18_spill]] %s2179_s24  ;;  %p3296_p1 = scmp.eq.s32.totalorder %s2183_s25, 0 }
  0x14   : > { %p3295_p2 = scmp.eq.s32.totalorder %s2283_s26, 0  ;;  %s67_s29 = sadd.s32 1, %s2151_s17 }
  0x15   : > { %s3429_s27 = smov (%p2286_p0, %s31_s27), 0  ;;  %p74_p3 = scmp.ne.s32.totalorder %s2151_s17, %s2147_s16 }
  0x16   : > { %3332 = sst [smem:[#allocation19_spill]] %s3429_s27  ;;  %p80_p4 = scmp.ne.s32.totalorder %s2147_s16, %s2143_s15 }
  0x17   : > { %s64_s30 = ssub.s32 %s2175_s23, %s3429_s27  ;;  %p76_p6 = por %p74_p3, %p3296_p1 }
  0x18   : > { %p65_p5 = scmp.eq.s32.totalorder %s64_s30, 0  ;;  %p2306_p7 = por %p80_p4, %p3295_p2 }
  0x19   : > { %p3294_p8 = scmp.lt.s32.totalorder %s2183_s25, 4  ;;  %s203_s6 = sand.u32 1, %s2183_s25  }
  0x1a   : > { %s3333_s4 = scalar_select %p2306_p7, 1, 0 }
  0x1b   : > { %s2312_s5 = scalar_select %p65_p5, %s2151_s17, %s67_s29  }
  0x1c   : > { %s205_s7 = sand.u32 1, %s2151_s17   ;;  %s1528_s9 = sshll.u32 %s2175_s23, 11 }
  0x1d   : > { %3334 = sst [smem:[#allocation20_spill]] %s2312_s5  ;;  %s1502_s8 = sshll.u32 %s205_s7, 7 }
  0x1e   : > { %s3335_s1 = sld [smem:[#allocation39_spill]]  ;;  %s207_s30 = scalar_lea.vmem [#allocation7], %s1502_s8 }
  0x1f   : > { %s214_s27 = sshll.u32 %s207_s30, 4  ;;  %p2326_p9 = pnand %p3294_p8, %p76_p6  ;;  %s2322_s27 = int_to_ptr.vmem [resolvable:$true] %s214_s27 }
  0x20   : > { %s2332_s7 = scalar_lea.sflag [#allocation8], %s203_s6 }
  0x21   : > { %p1941_p13 = pneg %p2326_p9 }
  0x24   : > { %s2320_s15 = scalar_lea.hbm %s3335_s1, %s1528_s9  ;;  %s1944_s11 = scalar_lea.hbm %s3335_s1, 4096 }
  0x25   : > { %s1939_s9 = scalar_lea.hbm %s2320_s15, 2048  ;;  %p1945_p5 = scmp.lt.u32.totalorder %s2320_s15, %s3335_s1 }
  0x26   : > { %p1940_p12 = scmp.ne.s32.totalorder %s2320_s15, %s1939_s9  ;;  %p1946_p6 = scmp.lt.u32.totalorder %s1944_s11, %s1939_s9 }
  0x27   : > { %p1948_p2 = scmp.lt.u32.totalorder %s1939_s9, %s2320_s15 }
  0x28   : > { %p1942_p3 = pnand %p1941_p13, %p1940_p12  ;;  %p1947_p8 = por %p1946_p6, %p1945_p5 }
  0x2a   : > { %p1943_p4 = pneg %p1942_p3  ;;  %p1949_p1 = por %p1948_p2, %p1947_p8 }
  0x2c   : > { %p1950_p10 = pnand %p1949_p1, %p1943_p4 }
  0x2e   : > { %1953 = shalt.err (!%p1950_p10)
}
  0x2f   : > { %s1954_s6 = scalar_lea.vmem %s2322_s27, 2048  ;;  %s2185_s8 = smov [#allocation7]  }
  0x30   : > { %p1955_p12 = scmp.ne.s32.totalorder %s2322_s27, %s1954_s6  ;;  %s1959_s10 = sshll.u32 %s2185_s8, 4  ;;  %s1960_s10 = int_to_ptr.vmem [resolvable:$false] %s1959_s10 }
  0x31   : > { %s1961_s23 = scalar_lea.vmem %s1960_s10, 4096  ;;  %p1962_p7 = scmp.lt.s32.totalorder %s2322_s27, %s1960_s10 }
  0x32   : > { %p1957_p3 = pnand %p1955_p12, %p1941_p13  ;;  %p1963_p5 = scmp.lt.s32.totalorder %s1961_s23, %s1954_s6 }
  0x34   : > { %p1958_p11 = pneg %p1957_p3  ;;  %p1964_p6 = por %p1963_p5, %p1962_p7 }
  0x36   : > { %p1965_p2 = pnand %p1964_p6, %p1958_p11 }
  0x38   : > { %1968 = shalt.err (!%p1965_p2)
}
  0x39   : > { %s3298_s9 = smov 128   ;;  %s3300_s11 = smov 8  }
  0x3a   : > { %1682 = dma.hbm_to_vmem [thread:$0]  (!%p2326_p9), %s2320_s15, 2048, %s2322_s27, %s2332_s7, %s3298_s9, %s3298_s9, %s3300_s11  }
  0x3b   : > { %p3337_p1 = scmp.lt.s32.totalorder %s2183_s25, 5  ;;  %p3338_p7 = scmp.ge.s32.totalorder %s2183_s25, 1 }
  0x3c   : > { %s1490_s6 = sadd.s32 4294967294, %s2183_s25   ;;  %s34_s8 = sadd.s32 1, %s2179_s24 }
  0x3d   : > { %p2367_p8 = pnand %p3338_p7, %p3337_p1  ;;  %s41_s23 = sadd.s32 1, %s2163_s20 }
  0x3e   : > { %s35_s10 = scalar_select %p2286_p0, %s34_s8, %s2179_s24 }
  0x3f   : > { %p48_p10 = scmp.ne.s32.totalorder %s2163_s20, %s2159_s19  ;;  %p54_p13 = scmp.ne.s32.totalorder %s2159_s19, %s2155_s18 }
  0x40   : > { %p36_p11 = scmp.ge.s32.totalorder %s35_s10, 2  ;;  %p3340_p9 = scmp.eq.s32.totalorder %s2183_s25, 0 }
  0x41   : > { %p3343_p0 = scmp.eq.s32.totalorder %s2283_s26, 0  ;;  %s92_s15 = ssub.s32 0, %s34_s8 }
  0x42   : > { %p2386_p4 = por %p3340_p9, %p48_p10  ;;  %s3431_s10 = smov (%p36_p11, %s35_s10), 0 }
  0x43   : > { %3342 = sst [smem:[#allocation21_spill]] %s3431_s10  ;;  %p2397_p12 = por %p3343_p0, %p54_p13 }
  0x44   : > { %s38_s29 = ssub.s32 %s2179_s24, %s3431_s10  ;;  %s2403_s9 = smin.u32 %s92_s15, %s34_s8 }
  0x45   : > { %s3344_s28 = scalar_select %p2397_p12, 1, 0 }
  0x46   : > { %p39_p3 = scmp.eq.s32.totalorder %s38_s29, 0  ;;  %s103_s11 = sadd.s32 1, %s3431_s10 }
  0x47   : > { %s105_s1 = ssub.s32 0, %s103_s11  ;;  %p156_p5 = scmp.eq.s32.totalorder %s2283_s26, 3 }
  0x48   : > { %s2407_s5 = scalar_select %p39_p3, %s2163_s20, %s41_s23  }
  0x49   : > { %s1494_s17 = smin.u32 %s105_s1, %s103_s11  ;;  %p162_p6 = scmp.eq.s32.totalorder %s1490_s6, 3 }
  0x4a   : > { %3345 = sst [smem:[#allocation22_spill]] %s2407_s5  ;;  %s2410_s3 = sand.u32 1, %s1494_s17  }
  0x4b   : > { %p2415_p2 = por %p156_p5, %p48_p10  ;;  %p2422_p1 = por %p162_p6, %p54_p13 }
  0x4c   : > { %s182_s15 = sand.u32 1, %s2163_s20   ;;  %s1527_s10 = sshll.u32 %s2179_s24, 11 }
  0x4d   : > { %s3346_s22 = scalar_select %p2415_p2, 1, 0 }
  0x4e   : > { %s3347_s8 = scalar_select %p2422_p1, 1, 0 }
  0x4f   : > { %s1499_s29 = sshll.u32 %s182_s15, 7  ;;  %s3348_s0 = sld [smem:[#allocation38_spill]] }
  0x50   : > { %s186_s17 = scalar_lea.vmem [#allocation4], %s1499_s29  ;;  %p3349_p7 = scmp.lt.s32.totalorder %s2183_s25, 4 }
  0x51   : > { %s193_s11 = sshll.u32 %s186_s17, 4  ;;  %s2443_s24 = scalar_lea.sflag [#allocation5], %s182_s15  ;;  %s2433_s11 = int_to_ptr.vmem [resolvable:$true] %s193_s11 }
  0x52   : > { %p2439_p10 = pnand %p3349_p7, %p2386_p4 }
  0x54   : > { %p1971_p13 = pneg %p2439_p10 }
  0x55   : > { %s2431_s1 = scalar_lea.hbm %s3348_s0, %s1527_s10  ;;  %s1974_s27 = scalar_lea.hbm %s3348_s0, 4096 }
  0x56   : > { %s1969_s5 = scalar_lea.hbm %s2431_s1, 2048  ;;  %p1975_p4 = scmp.lt.u32.totalorder %s2431_s1, %s3348_s0 }
  0x57   : > { %p1970_p11 = scmp.ne.s32.totalorder %s2431_s1, %s1969_s5  ;;  %p1976_p3 = scmp.lt.u32.totalorder %s1974_s27, %s1969_s5 }
  0x58   : > { %p1978_p6 = scmp.lt.u32.totalorder %s1969_s5, %s2431_s1 }
  0x59   : > { %p1972_p9 = pnand %p1971_p13, %p1970_p11  ;;  %p1977_p5 = por %p1976_p3, %p1975_p4 }
  0x5b   : > { %p1973_p0 = pneg %p1972_p9  ;;  %p1979_p7 = por %p1978_p6, %p1977_p5 }
  0x5d   : > { %p1980_p1 = pnand %p1979_p7, %p1973_p0 }
  0x5f   : > { %1983 = shalt.err (!%p1980_p1)
}
  0x60   : > { %s1984_s15 = scalar_lea.vmem %s2433_s11, 2048  ;;  %s2188_s10 = smov [#allocation4]  }
  0x61   : > { %p1985_p11 = scmp.ne.s32.totalorder %s2433_s11, %s1984_s15  ;;  %s1989_s29 = sshll.u32 %s2188_s10, 4  ;;  %s1990_s29 = int_to_ptr.vmem [resolvable:$false] %s1989_s29 }
  0x62   : > { %s1991_s23 = scalar_lea.vmem %s1990_s29, 4096  ;;  %p1992_p12 = scmp.lt.s32.totalorder %s2433_s11, %s1990_s29 }
  0x63   : > { %p1987_p9 = pnand %p1985_p11, %p1971_p13  ;;  %p1993_p4 = scmp.lt.s32.totalorder %s1991_s23, %s1984_s15 }
  0x65   : > { %p1988_p2 = pneg %p1987_p9  ;;  %p1994_p3 = por %p1993_p4, %p1992_p12 }
  0x67   : > { %p1995_p5 = pnand %p1994_p3, %p1988_p2 }
  0x69   : > { %1998 = shalt.err (!%p1995_p5)
}
  0x6a   : > { %s3351_s5 = smov 8   ;;  %s3352_s27 = smov 128  }
  0x6b   : > { %1679 = dma.hbm_to_vmem [thread:$0]  (!%p2439_p10), %s2431_s1, 2048, %s2433_s11, %s2443_s24, %s3352_s27, %s3352_s27, %s3351_s5  }
  0x6c   : > { %s94_s6 = sand.u32 1, %s2403_s9   ;;  %s119_s17 = sadd.s32 1, %s2139_s14 }
  0x6d   : > { %p1493_p12 = scmp.lt.s32.totalorder %s94_s6, 0  ;;  %s101_s15 = sadd.s32 2, %s94_s6 }
  0x6e   : > { %p1496_p2 = scmp.lt.s32.totalorder %s2410_s3, 0  ;;  %s114_s10 = sadd.s32 2, %s2410_s3 }
  0x6f   : > { %s3433_s15 = smov (!%p1493_p12, %s101_s15), %s94_s6  ;;  %p126_p1 = scmp.ne.s32.totalorder %s2139_s14, %s2135_s13 }
  0x70   : > { %s3435_s10 = smov (!%p1496_p2, %s114_s10), %s2410_s3  ;;  %p132_p13 = scmp.ne.s32.totalorder %s2135_s13, %s2131_s12 }
  0x71   : > { %s116_s29 = ssub.s32 %s3433_s15, %s3435_s10  ;;  %s226_s23 = sand.u32 1, %s2139_s14  }
  0x72   : > { %p117_p0 = scmp.eq.s32.totalorder %s116_s29, 0  ;;  %p3353_p6 = scmp.eq.s32.totalorder %s2183_s25, 0 }
  0x73   : > { %p3354_p11 = scmp.eq.s32.totalorder %s2283_s26, 0  ;;  %s1505_s9 = sshll.u32 %s226_s23, 7 }
  0x74   : > { %p128_p7 = por %p126_p1, %p3353_p6  ;;  %s1529_s11 = sshll.u32 %s3433_s15, 11 }
  0x75   : > { %p2488_p9 = por %p132_p13, %p3354_p11  ;;  %s2498_s3 = scalar_lea.hbm %s3290_s2, %s1529_s11 }
  0x76   : > { %s2493_s1 = scalar_select %p117_p0, %s2139_s14, %s119_s17  }
  0x77   : > { %s3355_s24 = scalar_select %p2488_p9, 1, 0 }
  0x78   : > { %s228_s12 = scalar_lea.vmem [#allocation9], %s1505_s9  ;;  %p3356_p10 = scmp.lt.s32.totalorder %s2183_s25, 4 }
  0x79   : > { %s248_s10 = sshll.u32 %s228_s12, 4  ;;  %s1999_s17 = scalar_lea.hbm %s2498_s3, 2048  ;;  %s2500_s10 = int_to_ptr.vmem [resolvable:$true] %s248_s10 }
  0x7a   : > { %p2504_p4 = pnand %p3356_p10, %p128_p7  ;;  %p2000_p3 = scmp.ne.s32.totalorder %s2498_s3, %s1999_s17 }
  0x7b   : > { %s2004_s23 = scalar_lea.hbm %s3290_s2, 4096  ;;  %p2005_p1 = scmp.lt.u32.totalorder %s2498_s3, %s3290_s2 }
  0x7c   : > { %p2001_p5 = pneg %p2504_p4  ;;  %p2006_p13 = scmp.lt.u32.totalorder %s2004_s23, %s1999_s17 }
  0x7d   : > { %p2008_p6 = scmp.lt.u32.totalorder %s1999_s17, %s2498_s3 }
  0x7e   : > { %p2002_p12 = pnand %p2001_p5, %p2000_p3  ;;  %p2007_p0 = por %p2006_p13, %p2005_p1 }
  0x80   : > { %p2003_p2 = pneg %p2002_p12  ;;  %p2009_p7 = por %p2008_p6, %p2007_p0 }
  0x82   : > { %p2010_p11 = pnand %p2009_p7, %p2003_p2 }
  0x84   : > { %2013 = shalt.err (!%p2010_p11)
}
  0x85   : > { %s2014_s6 = scalar_lea.vmem %s2500_s10, 2048  ;;  %s2189_s12 = smov [#allocation9]  }
  0x86   : > { %p2015_p10 = scmp.ne.s32.totalorder %s2500_s10, %s2014_s6  ;;  %s2019_s0 = sshll.u32 %s2189_s12, 4  ;;  %s2020_s0 = int_to_ptr.vmem [resolvable:$false] %s2019_s0 }
  0x87   : > { %s2021_s15 = scalar_lea.vmem %s2020_s0, 4096  ;;  %p2022_p9 = scmp.lt.s32.totalorder %s2500_s10, %s2020_s0 }
  0x88   : > { %p2017_p3 = pnand %p2015_p10, %p2001_p5  ;;  %p2023_p1 = scmp.lt.s32.totalorder %s2021_s15, %s2014_s6 }
  0x8a   : > { %p2018_p12 = pneg %p2017_p3  ;;  %p2024_p13 = por %p2023_p1, %p2022_p9 }
  0x8c   : > { %p2025_p0 = pnand %p2024_p13, %p2018_p12 }
  0x8e   : > { %2028 = shalt.err (!%p2025_p0)
}
  0x8f   : > { %1685 = dma.hbm_to_vmem [thread:$0]  (!%p2504_p4), %s2498_s3, 2048, %s2500_s10, %s2332_s7, %s3352_s27, %s3352_s27, %s3351_s5  }
  0x90   : > { %260 = sbr.rel (%p2367_p8) target bundleno = 1320 (0x528), region = 32 }
  0x97   : > { %s2540_s17 = sand.u32 1, %s2159_s19   ;;  %p3358_p9 = scmp.ne.s32.totalorder %s3344_s28, 0 }
  0x98   : > { %s1512_s23 = sshll.u32 %s2540_s17, 7  ;;  %s263_s9 = scalar_lea.sflag [#allocation5], %s2540_s17 }
  0x99   : > { %s2544_s11 = scalar_lea.vmem [#allocation4], %s1512_s23 }
  0x9a   : > { %2114 = dma.done.wait (%p3358_p9), %s263_s9, 2048  }
  0x9b   : > { %2116 = vsyncadd (%p3358_p9), %s263_s9, 4294965248  ;;  %s271_s7 = sand.u32 1, %s2283_s26   ;;  %s273_s30 = sand.u32 1, %s2147_s16  }
  0x9c   : > { %s1513_s5 = sshll.u32 %s273_s30, 7  ;;  %s272_s27 = scalar_lea.sflag [#allocation8], %s271_s7 }
  0x9d   : > { %s2552_s3 = scalar_lea.vmem [#allocation7], %s1513_s5  ;;  %p3359_p8 = scmp.ne.s32.totalorder %s3333_s4, 0 }
  0x9f   : > { %2118 = dma.done.wait (%p3359_p8), %s272_s27, 2048  }
  0xa0   : > { %2120 = vsyncadd (%p3359_p8), %s272_s27, 4294965248  ;;  %s282_s10 = sand.u32 1, %s2135_s13   ;;  %p3360_p4 = scmp.ne.s32.totalorder %s3355_s24, 0 }
  0xa1   : > { %s1514_s29 = sshll.u32 %s282_s10, 7 }
  0xa2   : > { %s2559_s28 = scalar_lea.vmem [#allocation9], %s1514_s29 }
  0xa3   : > { %2122 = dma.done.wait (%p3360_p4), %s272_s27, 2048  }
  0xa4   : > { %2124 = vsyncadd (%p3360_p4), %s272_s27, 4294965248  ;;  %s1515_s26 = sshll.u32 %s2540_s17, 3  ;;  %p1516_p5 = scmp.ne.s32.totalorder %s2167_s21, 0 }
  0xa5   : > { %s2566_s6 = scalar_lea.vmem [#allocation10], %s1515_s26  ;;  %vm337_vm0 = vcmask (!%p1516_p5), 7168   ;;  %v2190_v0 = vmov (!%p1516_p5), -inf   ;;  %v2191_v1 = vmov (!%p1516_p5), 0.0  }
  0xa6   : > { %336 = sbr.rel (%p1516_p5) target bundleno = 182 (0xb6), region = 48  ;;  %338 = vst.msk [vmem:[#allocation2] sm:$0xff] (!%p1516_p5), %vm337_vm0, %v2190_v0  ;;  %339 = vst.msk [vmem:[#allocation2 + $0x8] sm:$0xff] (!%p1516_p5), %vm337_vm0, %v2190_v0 }
  0xa7   : > { %340 = vst.msk [vmem:[#allocation2 + $0x10] sm:$0xff] (!%p1516_p5), %vm337_vm0, %v2190_v0  ;;  %341 = vst.msk [vmem:[#allocation2 + $0x18] sm:$0xff] (!%p1516_p5), %vm337_vm0, %v2190_v0 }
  0xa8   : > { %342 = vst.msk [vmem:[#allocation2 + $0x20] sm:$0xff] (!%p1516_p5), %vm337_vm0, %v2190_v0  ;;  %343 = vst.msk [vmem:[#allocation2 + $0x28] sm:$0xff] (!%p1516_p5), %vm337_vm0, %v2190_v0 }
  0xa9   : > { %344 = vst.msk [vmem:[#allocation2 + $0x30] sm:$0xff] (!%p1516_p5), %vm337_vm0, %v2190_v0  ;;  %345 = vst.msk [vmem:[#allocation2 + $0x38] sm:$0xff] (!%p1516_p5), %vm337_vm0, %v2190_v0 }
  0xaa   : > { %346 = vst.msk [vmem:[#allocation2 + $0x40] sm:$0xff] (!%p1516_p5), %vm337_vm0, %v2190_v0  ;;  %347 = vst.msk [vmem:[#allocation2 + $0x48] sm:$0xff] (!%p1516_p5), %vm337_vm0, %v2190_v0 }
  0xab   : > { %348 = vst.msk [vmem:[#allocation2 + $0x50] sm:$0xff] (!%p1516_p5), %vm337_vm0, %v2190_v0  ;;  %349 = vst.msk [vmem:[#allocation2 + $0x58] sm:$0xff] (!%p1516_p5), %vm337_vm0, %v2190_v0 }
  0xac   : > { %350 = vst.msk [vmem:[#allocation2 + $0x60] sm:$0xff] (!%p1516_p5), %vm337_vm0, %v2190_v0  ;;  %351 = vst.msk [vmem:[#allocation2 + $0x68] sm:$0xff] (!%p1516_p5), %vm337_vm0, %v2190_v0 }
  0xad   : > { %352 = vst.msk [vmem:[#allocation2 + $0x70] sm:$0xff] %vm337_vm0, %v2190_v0  ;;  %353 = vst.msk [vmem:[#allocation2 + $0x78] sm:$0xff] %vm337_vm0, %v2190_v0 }
  0xae   : > { %354 = vst.msk [vmem:[#allocation3] sm:$0xff] %vm337_vm0, %v2191_v1  ;;  %355 = vst.msk [vmem:[#allocation3 + $0x8] sm:$0xff] %vm337_vm0, %v2191_v1 }
  0xaf   : > { %356 = vst.msk [vmem:[#allocation3 + $0x10] sm:$0xff] %vm337_vm0, %v2191_v1  ;;  %357 = vst.msk [vmem:[#allocation3 + $0x18] sm:$0xff] %vm337_vm0, %v2191_v1 }
  0xb0   : > { %358 = vst.msk [vmem:[#allocation3 + $0x20] sm:$0xff] %vm337_vm0, %v2191_v1  ;;  %359 = vst.msk [vmem:[#allocation3 + $0x28] sm:$0xff] %vm337_vm0, %v2191_v1 }
  0xb1   : > { %360 = vst.msk [vmem:[#allocation3 + $0x30] sm:$0xff] %vm337_vm0, %v2191_v1  ;;  %361 = vst.msk [vmem:[#allocation3 + $0x38] sm:$0xff] %vm337_vm0, %v2191_v1 }
  0xb2   : > { %362 = vst.msk [vmem:[#allocation3 + $0x40] sm:$0xff] %vm337_vm0, %v2191_v1  ;;  %363 = vst.msk [vmem:[#allocation3 + $0x48] sm:$0xff] %vm337_vm0, %v2191_v1 }
  0xb3   : > { %364 = vst.msk [vmem:[#allocation3 + $0x50] sm:$0xff] %vm337_vm0, %v2191_v1  ;;  %365 = vst.msk [vmem:[#allocation3 + $0x58] sm:$0xff] %vm337_vm0, %v2191_v1 }
  0xb4   : > { %366 = vst.msk [vmem:[#allocation3 + $0x60] sm:$0xff] %vm337_vm0, %v2191_v1  ;;  %367 = vst.msk [vmem:[#allocation3 + $0x68] sm:$0xff] %vm337_vm0, %v2191_v1 }
  0xb5   : > { %368 = vst.msk [vmem:[#allocation3 + $0x70] sm:$0xff] %vm337_vm0, %v2191_v1  ;;  %369 = vst.msk [vmem:[#allocation3 + $0x78] sm:$0xff] %vm337_vm0, %v2191_v1 }
  0xb6 PF: > { %v386_v2 = vld [vmem:[%s2552_s3] sm:$0xff]  ;;  %v387_v3 = vld [vmem:[%s2552_s3 + $0x8] sm:$0xff]  ;;  %v388_v4 = vld [vmem:[%s2552_s3 + $0x10] sm:$0xff]  ;;  %s3361_s4 = sld [smem:[#allocation16_spill]]  ;;  %v548_v42 = vlaneseq  ;;  %s1518_s12 = sshll.u32 %s2167_s21, 7 }
  0xb7   : > { %v1618_v5 = vpack.c.bf16 %v387_v3, %v386_v2  ;;  %v389_v6 = vld [vmem:[%s2552_s3 + $0x18] sm:$0xff]  ;;  %v370_v8 = vld [vmem:[%s2544_s11] sm:$0xff]  ;;  %v391_v11 = vld [vmem:[%s2552_s3 + $0x28] sm:$0xff]  ;;  %v585_v48 = vstv %s1518_s12  ;;  %p1519_p2 = scmp.ne.s32.totalorder %s2167_s21, 1 }
  0xb8   : > { %v1622_v7 = vpack.c.bf16 %v389_v6, %v388_v4  ;;  %v378_v9 = vld [vmem:[%s2544_s11 + $0x40] sm:$0xff]  ;;  %1594 = vmatprep.mubr.f32.mxu0 %v370_v8  ;;  %v392_v13 = vld [vmem:[%s2552_s3 + $0x30] sm:$0xff]  ;;  %v393_v14 = vld [vmem:[%s2552_s3 + $0x38] sm:$0xff]  ;;  %v2633_v43 = vshrl.u32 %v548_v42, 7  ;;  %v584_v45 = vand.u32 127, %v548_v42 }
  0xb9   : > { %1619 = vmatprep.subr.bf16.mxu0 %v1618_v5  ;;  %1650 = vmatprep.subr.bf16.mxu1 %v1618_v5  ;;  %v390_v10 = vld [vmem:[%s2552_s3 + $0x20] sm:$0xff]  ;;  %v1630_v15 = vpack.c.bf16 %v393_v14, %v392_v13  ;;  %v395_v17 = vld [vmem:[%s2552_s3 + $0x48] sm:$0xff]  ;;  %v396_v19 = vld [vmem:[%s2552_s3 + $0x50] sm:$0xff] }
  0xba   : > { %1621 = vmatpush3.bf16.xpose.msra.mxu0 %v1618_v5  ;;  %1658 = vmatpush3.bf16.xpose.msra.mxu1 %v1618_v5  ;;  %v1626_v12 = vpack.c.bf16 %v391_v11, %v390_v10  ;;  %v394_v16 = vld [vmem:[%s2552_s3 + $0x40] sm:$0xff]  ;;  %v397_v20 = vld [vmem:[%s2552_s3 + $0x58] sm:$0xff]  ;;  %v399_v23 = vld [vmem:[%s2552_s3 + $0x68] sm:$0xff]  ;;  %v2640_v44 = vadd.s32 72, %v2633_v43  ;;  %v2643_v46 = vadd.s32 8, %v2633_v43  ;;  %v2650_v50 = vadd.s32 %v585_v48, %v584_v45 }
  0xbb   : > { %1623 = vmatprep.subr.bf16.mxu0 %v1622_v7  ;;  %1651 = vmatprep.subr.bf16.mxu1 %v1622_v7  ;;  %v1634_v18 = vpack.c.bf16 %v395_v17, %v394_v16  ;;  %v1638_v21 = vpack.c.bf16 %v397_v20, %v396_v19  ;;  %v398_v22 = vld [vmem:[%s2552_s3 + $0x60] sm:$0xff]  ;;  %v400_v25 = vld [vmem:[%s2552_s3 + $0x70] sm:$0xff]  ;;  %v401_v26 = vld [vmem:[%s2552_s3 + $0x78] sm:$0xff]  ;;  %v2655_v52 = vadd.s32 24, %v2633_v43  ;;  %v2658_v53 = vadd.s32 88, %v2633_v43 }
  0xbc   : > { %1606 = vmatprep.mubr.f32.mxu1 %v378_v9  ;;  %v1642_v24 = vpack.c.bf16 %v399_v23, %v398_v22  ;;  %v1646_v27 = vpack.c.bf16 %v401_v26, %v400_v25  ;;  %v371_v28 = vld [vmem:[%s2544_s11 + $0x8] sm:$0xff]  ;;  %v372_v30 = vld [vmem:[%s2544_s11 + $0x10] sm:$0xff]  ;;  %v373_v32 = vld [vmem:[%s2544_s11 + $0x18] sm:$0xff]  ;;  %s2636_s24 = sshll.u32 %s3361_s4, 7  ;;  %3362 = vst [vmem:[#allocation23_spill] sm:$0xff] %v2640_v44  ;;  %v2667_v56 = vadd.s32 64, %v2633_v43 }
  0xbd   : > { %v379_v29 = vld [vmem:[%s2544_s11 + $0x48] sm:$0xff]  ;;  %v380_v31 = vld [vmem:[%s2544_s11 + $0x50] sm:$0xff]  ;;  %v381_v33 = vld [vmem:[%s2544_s11 + $0x58] sm:$0xff]  ;;  %3363 = vst [vmem:[#allocation24_spill] sm:$0xff] %v2643_v46  ;;  %v2646_v47 = vstv %s2636_s24  ;;  %v2672_v60 = vadd.s32 80, %v2633_v43  ;;  %v2685_v2 = vadd.s32 16, %v2633_v43 }
  0xbe   : > { %v374_v34 = vld [vmem:[%s2544_s11 + $0x20] sm:$0xff]  ;;  %v375_v36 = vld [vmem:[%s2544_s11 + $0x28] sm:$0xff]  ;;  %v376_v38 = vld [vmem:[%s2544_s11 + $0x30] sm:$0xff]  ;;  %v575_v49 = vadd.s32 %v2646_v47, %v2640_v44  ;;  %v567_v51 = vadd.s32 %v2646_v47, %v2643_v46  ;;  %3364 = vst [vmem:[#allocation25_spill] sm:$0xff] %v2655_v52  ;;  %v566_v54 = vadd.s32 %v2646_v47, %v2633_v43  ;;  %v569_v55 = vadd.s32 %v2646_v47, %v2655_v52  ;;  %s1233_s21 = ssub.s32 (!%p1519_p2), 0, %s2636_s24  ;;  %p1232_p6 = scmp.lt.s32.totalorder (!%p1519_p2), %s2636_s24, 0 }
  0xbf   : > { %v382_v35 = vld [vmem:[%s2544_s11 + $0x60] sm:$0xff]  ;;  %v383_v37 = vld [vmem:[%s2544_s11 + $0x68] sm:$0xff]  ;;  %v384_v39 = vld [vmem:[%s2544_s11 + $0x70] sm:$0xff]  ;;  %3365 = vst [vmem:[#allocation26_spill] sm:$0xff] %v2658_v53  ;;  %v577_v59 = vadd.s32 %v2646_v47, %v2658_v53  ;;  %v574_v1 = vadd.s32 %v2646_v47, %v2667_v56  ;;  %v576_v5 = vadd.s32 %v2646_v47, %v2672_v60  ;;  %v2691_v6 = vadd.s32 40, %v2633_v43  ;;  %s3095_s0 = smin.u32 (!%p1519_p2), %s2636_s24, %s1233_s21 }
  0xc0   : > { %v377_v40 = vld [vmem:[%s2544_s11 + $0x38] sm:$0xff]  ;;  %vm596_vm1 = vcmp.eq.s32.totalorder %v575_v49, %v2650_v50  ;;  %vm588_vm2 = vcmp.eq.s32.totalorder %v567_v51, %v2650_v50  ;;  %3366 = vst [vmem:[#allocation27_spill] sm:$0xff] %v2667_v56  ;;  %3367 = vst [vmem:[#allocation28_spill] sm:$0xff] %v2672_v60  ;;  %vm587_vm3 = vcmp.eq.s32.totalorder %v566_v54, %v2650_v50  ;;  %v2708_v14 = vadd.s32 104, %v2633_v43  ;;  %s1235_s15 = sand.u32 (!%p1519_p2), 127, %s3095_s0  }
  0xc1   : > { %v385_v41 = vld [vmem:[%s2544_s11 + $0x78] sm:$0xff]  ;;  %vm590_vm4 = vcmp.eq.s32.totalorder %v569_v55, %v2650_v50  ;;  %3368 = vst [vmem:[#allocation29_spill] sm:$0xff] %v2685_v2  ;;  %vm598_vm5 = vcmp.eq.s32.totalorder %v577_v59, %v2650_v50  ;;  %3369 = vst [vmem:[#allocation30_spill] sm:$0xff] %v2691_v6  ;;  %vm595_vm6 = vcmp.eq.s32.totalorder %v574_v1, %v2650_v50  ;;  %v2716_v19 = vadd.s32 96, %v2633_v43  ;;  %v2787_v55 = vld [vmem:[#allocation2 + $0x8] sm:$0xff]  ;;  %s1236_s23 = ssub.s32 (!%p1519_p2), 0, %s1235_s15 }
  0xc2   : > { %1625 = vmatpush3.bf16.xpose.msra.mxu0 %v1622_v7  ;;  %1659 = vmatpush3.bf16.xpose.msra.mxu1 %v1622_v7  ;;  %v2694_v7 = vadd.s32 32, %v2633_v43  ;;  %3371 = vst [vmem:[#allocation32_spill] sm:$0xff] %v2708_v14  ;;  %vm597_vm7 = vcmp.eq.s32.totalorder %v576_v5, %v2650_v50  ;;  %v571_v16 = vadd.s32 %v2646_v47, %v2691_v6  ;;  %v2728_v25 = vadd.s32 56, %v2633_v43 }
  0xc3   : > { %1627 = vmatprep.subr.bf16.mxu0 %v1626_v12  ;;  %1652 = vmatprep.subr.bf16.mxu1 %v1626_v12  ;;  %3372 = vst [vmem:[#allocation33_spill] sm:$0xff] %v2716_v19 }
  0xc4   : > { %3370 = vst [vmem:[#allocation31_spill] sm:$0xff] %v2694_v7  ;;  %3373 = vst [vmem:[#allocation34_spill] sm:$0xff] %v2728_v25  ;;  %vm592_vm9 = vcmp.eq.s32.totalorder %v571_v16, %v2650_v50 }
  0xca   : > { %1629 = vmatpush3.bf16.xpose.msra.mxu0 %v1626_v12  ;;  %1660 = vmatpush3.bf16.xpose.msra.mxu1 %v1626_v12  ;;  %v568_v12 = vadd.s32 %v2646_v47, %v2685_v2 }
  0xcb   : > { %1631 = vmatprep.subr.bf16.mxu0 %v1630_v15  ;;  %1653 = vmatprep.subr.bf16.mxu1 %v1630_v15 }
  0xcc   : > { %vm589_vm8 = vcmp.eq.s32.totalorder %v568_v12, %v2650_v50  ;;  %v2815_v12 = vld [vmem:[#allocation2 + $0x40] sm:$0xff] }
  0xd2   : > { %1633 = vmatpush3.bf16.xpose.msra.mxu0 %v1630_v15  ;;  %1661 = vmatpush3.bf16.xpose.msra.mxu1 %v1630_v15 }
  0xd3   : > { %1635 = vmatprep.subr.bf16.mxu0 %v1634_v18  ;;  %1654 = vmatprep.subr.bf16.mxu1 %v1634_v18 }
  0xda   : > { %1637 = vmatpush3.bf16.xpose.msra.mxu0 %v1634_v18  ;;  %1662 = vmatpush3.bf16.xpose.msra.mxu1 %v1634_v18  ;;  %v570_v18 = vadd.s32 %v2646_v47, %v2694_v7 }
  0xdb   : > { %1639 = vmatprep.subr.bf16.mxu0 %v1638_v21  ;;  %1655 = vmatprep.subr.bf16.mxu1 %v1638_v21 }
  0xdc   : > { %vm591_vm10 = vcmp.eq.s32.totalorder %v570_v18, %v2650_v50 }
  0xe2   : > { %1641 = vmatpush3.bf16.xpose.msra.mxu0 %v1638_v21  ;;  %1663 = vmatpush3.bf16.xpose.msra.mxu1 %v1638_v21 }
  0xe3   : > { %1643 = vmatprep.subr.bf16.mxu0 %v1642_v24  ;;  %1656 = vmatprep.subr.bf16.mxu1 %v1642_v24 }
  0xea   : > { %1645 = vmatpush3.bf16.xpose.msra.mxu0 %v1642_v24  ;;  %1664 = vmatpush3.bf16.xpose.msra.mxu1 %v1642_v24  ;;  %v579_v24 = vadd.s32 %v2646_v47, %v2708_v14 }
  0xeb   : > { %1647 = vmatprep.subr.bf16.mxu0 %v1646_v27  ;;  %1657 = vmatprep.subr.bf16.mxu1 %v1646_v27 }
  0xec   : > { %vm600_vm11 = vcmp.eq.s32.totalorder %v579_v24, %v2650_v50 }
  0xf2   : > { %1649 = vmatpush3.bf16.xpose.msra.mxu0 %v1646_v27  ;;  %1665 = vmatpush3.bf16.xpose.msra.mxu1 %v1646_v27 }
  0xf9   : > { %1595 = vmatmul.mubr.f32.vlgmr.msra.gmra.mrb[0].mxu0 %v371_v28  ;;  %1607 = vmatmul.mubr.f32.vlgmr.msra.gmra.mrb[0].mxu1 %v379_v29  ;;  %v578_v28 = vadd.s32 %v2646_v47, %v2716_v19  ;;  %v2735_v29 = vadd.s32 48, %v2633_v43 }
  0xfa   : > { %1597 = vmatprep.mubr.f32.mxu0 %v372_v30  ;;  %1609 = vmatprep.mubr.f32.mxu1 %v380_v31 }
  0xfb   : > { %3374 = vst [vmem:[#allocation35_spill] sm:$0xff] %v2735_v29  ;;  %vm599_vm12 = vcmp.eq.s32.totalorder %v578_v28, %v2650_v50  ;;  %v2894_v28 = vld [vmem:[#allocation2 + $0x30] sm:$0xff] }
  0xfd   : > { %1598 = vmatmul.mubr.f32.gmra.mrb[2].mxu0 %v373_v32  ;;  %1610 = vmatmul.mubr.f32.gmra.mrb[2].mxu1 %v381_v33 }
  0xfe   : > { %1600 = vmatprep.mubr.f32.mxu0 %v374_v34  ;;  %1612 = vmatprep.mubr.f32.mxu1 %v382_v35  ;;  %v573_v35 = vadd.s32 %v2646_v47, %v2728_v25 }
 0x100   : > { %vm594_vm13 = vcmp.eq.s32.totalorder %v573_v35, %v2650_v50 }
 0x101   : > { %1601 = vmatmul.mubr.f32.gmra.mrb[4].mxu0 %v375_v36  ;;  %1613 = vmatmul.mubr.f32.gmra.mrb[4].mxu1 %v383_v37  ;;  %v2749_v36 = vadd.s32 120, %v2633_v43  ;;  %v572_v37 = vadd.s32 %v2646_v47, %v2735_v29 }
 0x102   : > { %1603 = vmatprep.mubr.f32.mxu0 %v376_v38  ;;  %1615 = vmatprep.mubr.f32.mxu1 %v384_v39  ;;  %v2755_v38 = vadd.s32 112, %v2633_v43 }
 0x103   : > { %3375 = vst [vmem:[#allocation36_spill] sm:$0xff] %v2749_v36  ;;  %v581_v42 = vadd.s32 %v2646_v47, %v2749_v36  ;;  %vm593_vm14 = vcmp.eq.s32.totalorder %v572_v37, %v2650_v50  ;;  %v2914_v36 = vld [vmem:[#allocation2 + $0x70] sm:$0xff] }
 0x104   : > { %3376 = vst [vmem:[#allocation37_spill] sm:$0xff] %v2755_v38  ;;  %v580_v45 = vadd.s32 %v2646_v47, %v2755_v38  ;;  %v2785_v47 = vld [vmem:[#allocation2 + $0x48] sm:$0xff] }
 0x105   : > { %1604 = vmatmul.mubr.f32.gmra.mrb[6].mxu0 %v377_v40  ;;  %1616 = vmatmul.mubr.f32.gmra.mrb[6].mxu1 %v385_v41  ;;  %v2192_v41 = vmov 0   ;;  %vm602_vm15 = vcmp.eq.s32.totalorder %v581_v42, %v2650_v50  ;;  %v2854_v42 = vld [vmem:[#allocation2 + $0x28] sm:$0xff] }
 0x106   : > { %1810 = vset.pattern.permute.xlu0 %v2192_v41  ;;  %1809 = vset.pattern.permute.xlu1 %v2192_v41  ;;  %vm601_vm0 = vcmp.eq.s32.totalorder %v580_v45, %v2650_v50  ;;  %v2856_v45 = vld [vmem:[#allocation2 + $0x20] sm:$0xff] }
 0x1cc   : > { %v1596_v57 = vpop.f32.mrb[0].mxu0  ;;  %v1608_v58 = vpop.f32.mrb[0].mxu1 }
 0x1cd   : > { %v468_v61 = vpop.f32.mrb[1].mxu0  ;;  %v2674_v62 = vsel %vm596_vm1, -1e+30, %v1608_v58  ;;  %v2676_v63 = vsel %vm588_vm2, -1e+30, %v1596_v57  ;;  %v508_v0 = vpop.f32.mrb[1].mxu1 }
 0x1ce   : > { %653 = vmax.xlane.f32.xlu1 %v2674_v62  ;;  %637 = vmax.xlane.f32.xlu0 %v2676_v63  ;;  %v2696_v8 = vsel %vm587_vm3, -1e+30, %v468_v61  ;;  %v2718_v20 = vsel %vm595_vm6, -1e+30, %v508_v0  ;;  %vm939_vm1 = vcmask 7168   ;;  %v2795_v61 = vld [vmem:[#allocation2] sm:$0xff] }
 0x1cf   : > { %v2797_v0 = vld [vmem:[#allocation2 + $0x18] sm:$0xff] }
 0x1d0   : > { %v1599_v3 = vpop.f32.mrb[2].mxu0  ;;  %v1611_v4 = vpop.f32.mrb[2].mxu1 }
 0x1d1   : > { %v2698_v9 = vsel %vm590_vm4, -1e+30, %v1599_v3  ;;  %v478_v10 = vpop.f32.mrb[3].mxu0  ;;  %v518_v11 = vpop.f32.mrb[3].mxu1  ;;  %v2705_v13 = vsel %vm598_vm5, -1e+30, %v1611_v4 }
 0x1d2   : > { %635 = vmax.xlane.f32.xlu0 %v2696_v8  ;;  %641 = vmax.xlane.f32.xlu1 %v2698_v9  ;;  %v2723_v23 = vsel %vm597_vm7, -1e+30, %v518_v11  ;;  %v2737_v30 = vsel %vm589_vm8, -1e+30, %v478_v10  ;;  %v2912_v3 = vld [vmem:[#allocation2 + $0x78] sm:$0xff] }
 0x1d4   : > { %v1602_v15 = vpop.f32.mrb[4].mxu0  ;;  %v1614_v17 = vpop.f32.mrb[4].mxu1 }
 0x1d5   : > { %v488_v21 = vpop.f32.mrb[5].mxu0  ;;  %v528_v22 = vpop.f32.mrb[5].mxu1  ;;  %v2741_v33 = vsel %vm592_vm9, -1e+30, %v1602_v15  ;;  %v2759_v39 = vsel %vm600_vm11, -1e+30, %v1614_v17 }
 0x1d6   : > { %651 = vmax.xlane.f32.xlu0 %v2718_v20  ;;  %657 = vmax.xlane.f32.xlu1 %v2705_v13  ;;  %v2744_v34 = vsel %vm591_vm10, -1e+30, %v488_v21  ;;  %v2761_v40 = vsel %vm599_vm12, -1e+30, %v528_v22  ;;  %v2817_v15 = vld [vmem:[#allocation2 + $0x58] sm:$0xff] }
 0x1d8   : > { %v1605_v26 = vpop.f32.mrb[6].mxu0  ;;  %v1617_v27 = vpop.f32.mrb[6].mxu1 }
 0x1d9   : > { %v498_v31 = vpop.f32.mrb[7].mxu0  ;;  %v538_v32 = vpop.f32.mrb[7].mxu1  ;;  %v2771_v48 = vsel %vm594_vm13, -1e+30, %v1605_v26  ;;  %v2779_v51 = vsel %vm602_vm15, -1e+30, %v1617_v27 }
 0x1da   : > { %655 = vmax.xlane.f32.xlu0 %v2723_v23  ;;  %639 = vmax.xlane.f32.xlu1 %v2737_v30  ;;  %v2773_v49 = vsel %vm593_vm14, -1e+30, %v498_v31  ;;  %v2781_v54 = vsel %vm601_vm0, -1e+30, %v538_v32  ;;  %v2834_v26 = vld [vmem:[#allocation2 + $0x50] sm:$0xff] }
 0x1db   : > { %v2836_v27 = vld [vmem:[#allocation2 + $0x10] sm:$0xff] }
 0x1de   : > { %645 = vmax.xlane.f32.xlu1 %v2741_v33  ;;  %643 = vmax.xlane.f32.xlu0 %v2744_v34 }
 0x1e2   : > { %661 = vmax.xlane.f32.xlu1 %v2759_v39  ;;  %659 = vmax.xlane.f32.xlu0 %v2761_v40 }
 0x1e6   : > { %649 = vmax.xlane.f32.xlu1 %v2771_v48  ;;  %647 = vmax.xlane.f32.xlu0 %v2773_v49 }
 0x1ea   : > { %665 = vmax.xlane.f32.xlu1 %v2779_v51  ;;  %663 = vmax.xlane.f32.xlu0 %v2781_v54 }
 0x25b   : > { %v654_v57 = vpop.xlane.xlu1 %653  ;;  %v638_v58 = vpop.xlane.xlu0 %637 }
 0x25c   : > { %v2790_v50 = vmax.f32 %v2785_v47, %v654_v57  ;;  %v2793_v59 = vmax.f32 %v2787_v55, %v638_v58  ;;  %v2892_v57 = vld [vmem:[#allocation2 + $0x38] sm:$0xff] }
 0x25e   : > { %965 = vst.msk [vmem:[#allocation2 + $0x48] sm:$0xff] %vm939_vm1, %v2790_v50  ;;  %957 = vst.msk [vmem:[#allocation2 + $0x8] sm:$0xff] %vm939_vm1, %v2793_v59  ;;  %770 = vperm.xlu1 %1809, %v2793_v59   ;;  %810 = vperm.xlu0 %1810, %v2790_v50  }
 0x25f   : > { %v636_v4 = vpop.xlane.xlu0 %635  ;;  %v642_v5 = vpop.xlane.xlu1 %641 }
 0x260   : > { %v2810_v10 = vmax.f32 %v2795_v61, %v636_v4  ;;  %v2813_v11 = vmax.f32 %v2797_v0, %v642_v5 }
 0x262   : > { %956 = vst.msk [vmem:[#allocation2] sm:$0xff] %vm939_vm1, %v2810_v10  ;;  %959 = vst.msk [vmem:[#allocation2 + $0x18] sm:$0xff] %vm939_vm1, %v2813_v11  ;;  %765 = vperm.xlu0 %1810, %v2810_v10  }
 0x263   : > { %v652_v18 = vpop.xlane.xlu0 %651  ;;  %v658_v21 = vpop.xlane.xlu1 %657 }
 0x264   : > { %v2829_v22 = vmax.f32 %v2815_v12, %v652_v18  ;;  %v2832_v24 = vmax.f32 %v2817_v15, %v658_v21 }
 0x266   : > { %964 = vst.msk [vmem:[#allocation2 + $0x40] sm:$0xff] %vm939_vm1, %v2829_v22  ;;  %967 = vst.msk [vmem:[#allocation2 + $0x58] sm:$0xff] %vm939_vm1, %v2832_v24  ;;  %805 = vperm.xlu1 %1809, %v2829_v22   ;;  %820 = vperm.xlu0 %1810, %v2832_v24  }
 0x267   : > { %v656_v32 = vpop.xlane.xlu0 %655  ;;  %v640_v35 = vpop.xlane.xlu1 %639 }
 0x268   : > { %v2849_v37 = vmax.f32 %v2834_v26, %v656_v32  ;;  %v2852_v41 = vmax.f32 %v2836_v27, %v640_v35  ;;  %v2873_v32 = vld [vmem:[#allocation2 + $0x68] sm:$0xff]  ;;  %v2875_v35 = vld [vmem:[#allocation2 + $0x60] sm:$0xff] }
 0x26a   : > { %966 = vst.msk [vmem:[#allocation2 + $0x50] sm:$0xff] %vm939_vm1, %v2849_v37  ;;  %958 = vst.msk [vmem:[#allocation2 + $0x10] sm:$0xff] %vm939_vm1, %v2852_v41  ;;  %780 = vperm.xlu1 %1809, %v2813_v11  }
 0x26b   : > { %v646_v4 = vpop.xlane.xlu1 %645  ;;  %v644_v5 = vpop.xlane.xlu0 %643 }
 0x26c   : > { %v2868_v18 = vmax.f32 %v2854_v42, %v646_v4  ;;  %v2871_v21 = vmax.f32 %v2856_v45, %v644_v5 }
 0x26e   : > { %961 = vst.msk [vmem:[#allocation2 + $0x28] sm:$0xff] %vm939_vm1, %v2868_v18  ;;  %775 = vperm.xlu1 %1809, %v2852_v41   ;;  %960 = vst.msk [vmem:[#allocation2 + $0x20] sm:$0xff] %vm939_vm1, %v2871_v21 }
 0x26f   : > { %v662_v4 = vpop.xlane.xlu1 %661  ;;  %v660_v5 = vpop.xlane.xlu0 %659 }
 0x270   : > { %v2887_v31 = vmax.f32 %v2873_v32, %v662_v4  ;;  %v2890_v17 = vmax.f32 %v2875_v35, %v660_v5 }
 0x272   : > { %969 = vst.msk [vmem:[#allocation2 + $0x68] sm:$0xff] %vm939_vm1, %v2887_v31  ;;  %815 = vperm.xlu1 %1809, %v2849_v37   ;;  %830 = vperm.xlu0 %1810, %v2887_v31   ;;  %968 = vst.msk [vmem:[#allocation2 + $0x60] sm:$0xff] %vm939_vm1, %v2890_v17 }
 0x273   : > { %v650_v5 = vpop.xlane.xlu1 %649  ;;  %v648_v58 = vpop.xlane.xlu0 %647 }
 0x274   : > { %v2907_v1 = vmax.f32 %v2892_v57, %v650_v5  ;;  %v2910_v16 = vmax.f32 %v2894_v28, %v648_v58 }
 0x276   : > { %963 = vst.msk [vmem:[#allocation2 + $0x38] sm:$0xff] %vm939_vm1, %v2907_v1  ;;  %790 = vperm.xlu1 %1809, %v2868_v18   ;;  %962 = vst.msk [vmem:[#allocation2 + $0x30] sm:$0xff] %vm939_vm1, %v2910_v16 }
 0x277   : > { %v666_v58 = vpop.xlane.xlu1 %665  ;;  %v664_v5 = vpop.xlane.xlu0 %663 }
 0x278   : > { %v2926_v14 = vmax.f32 %v2912_v3, %v666_v58  ;;  %v2929_v19 = vmax.f32 %v2914_v36, %v664_v5 }
 0x27a   : > { %971 = vst.msk [vmem:[#allocation2 + $0x78] sm:$0xff] %vm939_vm1, %v2926_v14  ;;  %785 = vperm.xlu1 %1809, %v2871_v21   ;;  %840 = vperm.xlu0 %1810, %v2926_v14   ;;  %970 = vst.msk [vmem:[#allocation2 + $0x70] sm:$0xff] %vm939_vm1, %v2929_v19 }
 0x27e   : > { %825 = vperm.xlu1 %1809, %v2890_v17  }
 0x282   : > { %800 = vperm.xlu1 %1809, %v2907_v1  }
 0x286   : > { %795 = vperm.xlu1 %1809, %v2910_v16  }
 0x28a   : > { %835 = vperm.xlu1 %1809, %v2929_v19  }
 0x2dd   : > { %v771_v58 = vpop.permute.xlu1 %770  ;;  %v811_v5 = vpop.permute.xlu0 %810 }
 0x2de   : > { %v844_v38 = vsub.f32 %v2676_v63, %v771_v58  ;;  %v852_v53 = vsub.f32 %v2674_v62, %v811_v5 }
 0x2e0   : > { %v861_v60 = vmul.f32 1.442695, %v844_v38  ;;  %v877_v44 = vmul.f32 1.442695, %v852_v53 }
 0x2e1   : > { %v766_v4 = vpop.permute.xlu0 %765 }
 0x2e2   : > { %1811 = vpow2.f32 %v861_v60  ;;  %v843_v56 = vsub.f32 %v2696_v8, %v766_v4 }
 0x2e3   : > { %1813 = vpow2.f32 %v877_v44 }
 0x2e4   : > { %v859_v25 = vmul.f32 1.442695, %v843_v56 }
 0x2e5   : > { %v806_v29 = vpop.permute.xlu1 %805  ;;  %v821_v7 = vpop.permute.xlu0 %820 }
 0x2e6   : > { %1815 = vpow2.f32 %v859_v25  ;;  %v851_v6 = vsub.f32 %v2718_v20, %v806_v29  ;;  %v854_v46 = vsub.f32 %v2705_v13, %v821_v7 }
 0x2e8   : > { %v875_v52 = vmul.f32 1.442695, %v851_v6  ;;  %v881_v60 = vmul.f32 1.442695, %v854_v46 }
 0x2e9   : > { %v781_v2 = vpop.permute.xlu1 %780 }
 0x2ea   : > { %1817 = vpow2.f32 %v875_v52  ;;  %v846_v62 = vsub.f32 %v2698_v9, %v781_v2 }
 0x2ec   : > { %v1812_v63 = vpop.eup %1811  ;;  %v865_v53 = vmul.f32 1.442695, %v846_v62 }
 0x2ed   : > { %v1814_v38 = vpop.eup %1813  ;;  %v776_v58 = vpop.permute.xlu1 %775  ;;  %893 = vadd.xlane.f32.xlu0 %v1812_v63 }
 0x2ee   : > { %1819 = vpow2.f32 %v865_v53  ;;  %v845_v44 = vsub.f32 %v2737_v30, %v776_v58  ;;  %909 = vadd.xlane.f32.xlu1 %v1814_v38 }
 0x2ef   : > { %1821 = vpow2.f32 %v881_v60 }
 0x2f0   : > { %v1816_v56 = vpop.eup %1815  ;;  %v863_v8 = vmul.f32 1.442695, %v845_v44 }
 0x2f1   : > { %v816_v6 = vpop.permute.xlu1 %815  ;;  %v831_v52 = vpop.permute.xlu0 %830 }
 0x2f2   : > { %1823 = vpow2.f32 %v863_v8  ;;  %v853_v7 = vsub.f32 %v2723_v23, %v816_v6  ;;  %891 = vadd.xlane.f32.xlu1 %v1816_v56  ;;  %v856_v13 = vsub.f32 %v2759_v39, %v831_v52 }
 0x2f4   : > { %v1818_v2 = vpop.eup %1817  ;;  %v879_v9 = vmul.f32 1.442695, %v853_v7  ;;  %v885_v30 = vmul.f32 1.442695, %v856_v13 }
 0x2f5   : > { %v791_v46 = vpop.permute.xlu1 %790  ;;  %907 = vadd.xlane.f32.xlu0 %v1818_v2 }
 0x2f6   : > { %1825 = vpow2.f32 %v879_v9  ;;  %v848_v20 = vsub.f32 %v2741_v33, %v791_v46 }
 0x2f8   : > { %v1820_v25 = vpop.eup %1819  ;;  %v869_v29 = vmul.f32 1.442695, %v848_v20 }
 0x2f9   : > { %v786_v4 = vpop.permute.xlu1 %785  ;;  %897 = vadd.xlane.f32.xlu1 %v1820_v25  ;;  %v1822_v23 = vpop.eup %1821 }
 0x2fa   : > { %1827 = vpow2.f32 %v869_v29  ;;  %v847_v5 = vsub.f32 %v2744_v34, %v786_v4  ;;  %v841_v39 = vpop.permute.xlu0 %840 }
 0x2fb   : > { %1829 = vpow2.f32 %v885_v30  ;;  %v858_v58 = vsub.f32 %v2779_v51, %v841_v39  ;;  %v3377_v30 = vsub.f32 %v2787_v55, %v2793_v59  ;;  %v3381_v39 = vsub.f32 %v2797_v0, %v2813_v11 }
 0x2fc   : > { %v1824_v62 = vpop.eup %1823  ;;  %v867_v63 = vmul.f32 1.442695, %v847_v5  ;;  %v3378_v5 = vsub.f32 %v2785_v47, %v2790_v50  ;;  %v3382_v50 = vsub.f32 %v2817_v15, %v2832_v24 }
 0x2fd   : > { %v826_v53 = vpop.permute.xlu1 %825  ;;  %895 = vadd.xlane.f32.xlu0 %v1824_v62  ;;  %913 = vadd.xlane.f32.xlu1 %v1822_v23  ;;  %v889_v6 = vmul.f32 1.442695, %v858_v58  ;;  %v717_v4 = vmul.f32 1.442695, %v3377_v30  ;;  %v3379_v23 = vsub.f32 %v2795_v61, %v2810_v10  ;;  %v721_v55 = vmul.f32 1.442695, %v3381_v39 }
 0x2fe   : > { %1831 = vpow2.f32 %v867_v63  ;;  %v855_v38 = vsub.f32 %v2761_v40, %v826_v53  ;;  %v3380_v63 = vsub.f32 %v2815_v12, %v2829_v22  ;;  %v3383_v61 = vsub.f32 %v2836_v27, %v2852_v41  ;;  %v691_v41 = vld [vmem:[#allocation3 + $0x40] sm:$0xff]  ;;  %v685_v30 = vld [vmem:[#allocation3 + $0x10] sm:$0xff] }
 0x2ff   : > { %v715_v62 = vmul.f32 1.442695, %v3379_v23  ;;  %v3389_v39 = vsub.f32 %v2892_v57, %v2907_v1 }
 0x300   : > { %v1826_v33 = vpop.eup %1825  ;;  %v883_v60 = vmul.f32 1.442695, %v855_v38  ;;  %v731_v53 = vmul.f32 1.442695, %v3380_v63  ;;  %v684_v38 = vld [vmem:[#allocation3 + $0x8] sm:$0xff] }
 0x301   : > { %v801_v44 = vpop.permute.xlu1 %800  ;;  %911 = vadd.xlane.f32.xlu0 %v1826_v33  ;;  %v737_v33 = vmul.f32 1.442695, %v3382_v50  ;;  %v719_v10 = vmul.f32 1.442695, %v3383_v61 }
 0x302   : > { %1833 = vpow2.f32 %v883_v60  ;;  %v850_v34 = vsub.f32 %v2771_v48, %v801_v44  ;;  %v692_v60 = vld [vmem:[#allocation3 + $0x48] sm:$0xff] }
 0x304   : > { %v1828_v56 = vpop.eup %1827  ;;  %v873_v8 = vmul.f32 1.442695, %v850_v34  ;;  %v683_v34 = vld [vmem:[#allocation3] sm:$0xff] }
 0x305   : > { %v796_v7 = vpop.permute.xlu1 %795  ;;  %901 = vadd.xlane.f32.xlu1 %v1828_v56  ;;  %v1830_v2 = vpop.eup %1829  ;;  %v3384_v56 = vsub.f32 %v2834_v26, %v2849_v37  ;;  %v686_v37 = vld [vmem:[#allocation3 + $0x18] sm:$0xff] }
 0x306   : > { %1835 = vpow2.f32 %v873_v8  ;;  %v849_v52 = vsub.f32 %v2773_v49, %v796_v7  ;;  %v3385_v7 = vsub.f32 %v2854_v42, %v2868_v18 }
 0x307   : > { %1837 = vpow2.f32 %v889_v6  ;;  %v735_v8 = vmul.f32 1.442695, %v3384_v56  ;;  %v695_v56 = vld [vmem:[#allocation3 + $0x60] sm:$0xff] }
 0x308   : > { %v1832_v9 = vpop.eup %1831  ;;  %v871_v40 = vmul.f32 1.442695, %v849_v52  ;;  %v725_v52 = vmul.f32 1.442695, %v3385_v7 }
 0x309   : > { %899 = vadd.xlane.f32.xlu0 %v1832_v9  ;;  %v836_v13 = vpop.permute.xlu1 %835  ;;  %917 = vadd.xlane.f32.xlu1 %v1830_v2 }
 0x30a   : > { %1839 = vpow2.f32 %v871_v40  ;;  %v857_v51 = vsub.f32 %v2781_v54, %v836_v13  ;;  %v733_v54 = vmul.f32 1.442695, %v3378_v5  ;;  %v3386_v13 = vsub.f32 %v2856_v45, %v2871_v21 }
 0x30b   : > { %v3388_v45 = vsub.f32 %v2875_v35, %v2890_v17 }
 0x30c   : > { %v1834_v46 = vpop.eup %1833  ;;  %v887_v48 = vmul.f32 1.442695, %v857_v51  ;;  %v723_v51 = vmul.f32 1.442695, %v3386_v13 }
 0x30d   : > { %915 = vadd.xlane.f32.xlu0 %v1834_v46  ;;  %v739_v21 = vmul.f32 1.442695, %v3388_v45  ;;  %v1154_v45 = vld [vmem:[%s2544_s11 + $0x10] sm:$0xff] (!%p1519_p2) }
 0x30e   : > { %1841 = vpow2.f32 %v887_v48  ;;  %v3387_v48 = vsub.f32 %v2873_v32, %v2887_v31 }
 0x30f   : > { %1843 = vpow2.f32 %v717_v4 }
 0x310   : > { %v1836_v20 = vpop.eup %1835  ;;  %1845 = vpow2.f32 %v733_v54 }
 0x311   : > { %905 = vadd.xlane.f32.xlu1 %v1836_v20  ;;  %v1838_v25 = vpop.eup %1837  ;;  %1847 = vpow2.f32 %v715_v62  ;;  %v741_v20 = vmul.f32 1.442695, %v3387_v48  ;;  %v693_v62 = vld [vmem:[#allocation3 + $0x50] sm:$0xff] }
 0x312   : > { %1849 = vpow2.f32 %v731_v53 }
 0x313   : > { %1851 = vpow2.f32 %v721_v55  ;;  %v729_v55 = vmul.f32 1.442695, %v3389_v39  ;;  %v1156_v39 = vld [vmem:[%s2544_s11 + $0x20] sm:$0xff] (!%p1519_p2) }
 0x314   : > { %v1840_v29 = vpop.eup %1839  ;;  %1853 = vpow2.f32 %v737_v33 }
 0x315   : > { %903 = vadd.xlane.f32.xlu0 %v1840_v29  ;;  %921 = vadd.xlane.f32.xlu1 %v1838_v25  ;;  %1855 = vpow2.f32 %v719_v10 }
 0x316   : > { %1857 = vpow2.f32 %v735_v8 }
 0x317   : > { %1859 = vpow2.f32 %v725_v52 }
 0x318   : > { %v1842_v49 = vpop.eup %1841  ;;  %1861 = vpow2.f32 %v723_v51 }
 0x319   : > { %919 = vadd.xlane.f32.xlu0 %v1842_v49  ;;  %v1844_v59 = vpop.eup %1843  ;;  %v694_v49 = vld [vmem:[#allocation3 + $0x58] sm:$0xff]  ;;  %1863 = vpow2.f32 %v741_v20  ;;  %v697_v20 = vld [vmem:[#allocation3 + $0x70] sm:$0xff] }
 0x31a   : > { %v1846_v47 = vpop.eup %1845  ;;  %v748_v12 = vmul.f32 %v1844_v59, %v684_v38  ;;  %1865 = vpow2.f32 %v739_v21  ;;  %v688_v38 = vld [vmem:[#allocation3 + $0x28] sm:$0xff] }
 0x31b   : > { %v756_v22 = vmul.f32 %v1846_v47, %v692_v60  ;;  %v1848_v44 = vpop.eup %1847  ;;  %v3390_v47 = vsub.f32 %v2894_v28, %v2910_v16  ;;  %1867 = vpow2.f32 %v729_v55  ;;  %v3391_v60 = vsub.f32 %v2912_v3, %v2926_v14  ;;  %v1172_v55 = vld [vmem:[%s2559_s28 + $0x20] sm:$0xff] (!%p1519_p2) }
 0x31c   : > { %v1850_v24 = vpop.eup %1849  ;;  %v747_v27 = vmul.f32 %v1848_v44, %v683_v34  ;;  %v3392_v16 = vsub.f32 %v2914_v36, %v2929_v19  ;;  %v690_v19 = vld [vmem:[#allocation3 + $0x38] sm:$0xff] }
 0x31d   : > { %v755_v9 = vmul.f32 %v1850_v24, %v691_v41  ;;  %v1852_v40 = vpop.eup %1851  ;;  %v727_v50 = vmul.f32 1.442695, %v3390_v47  ;;  %v745_v1 = vmul.f32 1.442695, %v3391_v60  ;;  %v1158_v47 = vld [vmem:[%s2544_s11 + $0x30] sm:$0xff] (!%p1519_p2)  ;;  %v1175_v60 = vld [vmem:[%s2559_s28 + $0x38] sm:$0xff] (!%p1519_p2) }
 0x31e   : > { %v1854_v25 = vpop.eup %1853  ;;  %v750_v42 = vmul.f32 %v1852_v40, %v686_v37  ;;  %v743_v28 = vmul.f32 1.442695, %v3392_v16  ;;  %v689_v40 = vld [vmem:[#allocation3 + $0x30] sm:$0xff] }
 0x31f   : > { %v1856_v18 = vpop.eup %1855  ;;  %v758_v5 = vmul.f32 %v1854_v25, %v694_v49  ;;  %1869 = vpow2.f32 %v727_v50  ;;  %v1174_v50 = vld [vmem:[%s2559_s28 + $0x30] sm:$0xff] (!%p1519_p2) }
 0x320   : > { %v749_v31 = vmul.f32 %v1856_v18, %v685_v30  ;;  %v1858_v32 = vpop.eup %1857  ;;  %1871 = vpow2.f32 %v745_v1  ;;  %v1152_v30 = vld [vmem:[%s2544_s11] sm:$0xff] (!%p1519_p2)  ;;  %v1190_v1 = vmul.f32 (!%p1519_p2), %v1174_v50, %v1158_v47  ;;  %v1162_v16 = vld [vmem:[%s2544_s11 + $0x50] sm:$0xff] (!%p1519_p2) }
 0x321   : > { %v757_v17 = vmul.f32 %v1858_v32, %v693_v62  ;;  %v1860_v35 = vpop.eup %1859  ;;  %1873 = vpow2.f32 %v743_v28  ;;  %v1169_v32 = vld [vmem:[%s2559_s28 + $0x8] sm:$0xff] (!%p1519_p2)  ;;  %v1171_v62 = vld [vmem:[%s2559_s28 + $0x18] sm:$0xff] (!%p1519_p2)  ;;  %v1178_v28 = vld [vmem:[%s2559_s28 + $0x50] sm:$0xff] (!%p1519_p2) }
 0x322   : > { %v1862_v57 = vpop.eup %1861  ;;  %v752_v61 = vmul.f32 %v1860_v35, %v688_v38  ;;  %v1173_v35 = vld [vmem:[%s2559_s28 + $0x28] sm:$0xff] (!%p1519_p2) }
 0x323   : > { %v1864_v10 = vpop.eup %1863 }
 0x324   : > { %v1866_v3 = vpop.eup %1865 }
 0x325   : > { %v759_v24 = vmul.f32 %v1866_v3, %v695_v56  ;;  %v1194_v3 = vmul.f32 (!%p1519_p2), %v1178_v28, %v1162_v16  ;;  %v1180_v56 = vld [vmem:[%s2559_s28 + $0x60] sm:$0xff] (!%p1519_p2) }
 0x37a   : > { %v894_v58 = vpop.xlane.xlu0 %893 }
 0x37b   : > { %v910_v0 = vpop.xlane.xlu1 %909  ;;  %v924_v11 = vadd.f32 %v894_v58, %v748_v12  ;;  %v687_v58 = vld [vmem:[#allocation3 + $0x20] sm:$0xff] }
 0x37c   : > { %v932_v15 = vadd.f32 %v910_v0, %v756_v22  ;;  %v696_v22 = vld [vmem:[#allocation3 + $0x68] sm:$0xff]  ;;  %v751_v14 = vmul.f32 %v1862_v57, %v687_v58 }
 0x37d   : > { %941 = vst.msk [vmem:[#allocation3 + $0x8] sm:$0xff] %vm939_vm1, %v924_v11  ;;  %v760_v0 = vmul.f32 %v1864_v10, %v696_v22  ;;  %v1176_v10 = vld [vmem:[%s2559_s28 + $0x40] sm:$0xff] (!%p1519_p2)  ;;  %v1177_v22 = vld [vmem:[%s2559_s28 + $0x48] sm:$0xff] (!%p1519_p2) }
 0x37e   : > { %949 = vst.msk [vmem:[#allocation3 + $0x48] sm:$0xff] %vm939_vm1, %v932_v15 }
 0x37f   : > { %v892_v6 = vpop.xlane.xlu1 %891 }
 0x380   : > { %v923_v2 = vadd.f32 %v892_v6, %v747_v27  ;;  %v1868_v27 = vpop.eup %1867 }
 0x381   : > { %v1870_v6 = vpop.eup %1869  ;;  %v754_v7 = vmul.f32 %v1868_v27, %v690_v19  ;;  %v1182_v19 = vld [vmem:[%s2559_s28 + $0x70] sm:$0xff] (!%p1519_p2) }
 0x382   : > { %940 = vst.msk [vmem:[#allocation3] sm:$0xff] %vm939_vm1, %v923_v2  ;;  %v908_v26 = vpop.xlane.xlu0 %907  ;;  %v1872_v52 = vpop.eup %1871  ;;  %v753_v13 = vmul.f32 %v1870_v6, %v689_v40  ;;  %v1183_v6 = vld [vmem:[%s2559_s28 + $0x78] sm:$0xff] (!%p1519_p2)  ;;  %v3062_v40 = vld [vmem:[#allocation2 + $0x8] sm:$0xff] (!%p1519_p2) }
 0x383   : > { %v931_v46 = vadd.f32 %v908_v26, %v755_v9  ;;  %v698_v9 = vld [vmem:[#allocation3 + $0x78] sm:$0xff]  ;;  %v1874_v51 = vpop.eup %1873 }
 0x384   : > { %v762_v37 = vmul.f32 %v1872_v52, %v698_v9  ;;  %v761_v18 = vmul.f32 %v1874_v51, %v697_v20  ;;  %v3060_v9 = vld [vmem:[#allocation2 + $0x10] sm:$0xff] (!%p1519_p2)  ;;  %v3067_v51 = vld [vmem:[#allocation2 + $0x18] sm:$0xff] (!%p1519_p2) }
 0x385   : > { %948 = vst.msk [vmem:[#allocation3 + $0x40] sm:$0xff] %vm939_vm1, %v931_v46 }
 0x386   : > { %v898_v29 = vpop.xlane.xlu1 %897 }
 0x387   : > { %v926_v4 = vadd.f32 %v898_v29, %v750_v42 }
 0x389   : > { %943 = vst.msk [vmem:[#allocation3 + $0x18] sm:$0xff] %vm939_vm1, %v926_v4  ;;  %v1168_v4 = vld [vmem:[%s2559_s28] sm:$0xff] (!%p1519_p2) }
 0x38a   : > { %v914_v54 = vpop.xlane.xlu1 %913  ;;  %v896_v23 = vpop.xlane.xlu0 %895  ;;  %v1184_v21 = vmul.f32 (!%p1519_p2), %v1168_v4, %v1152_v30  ;;  %v3077_v30 = vld [vmem:[#allocation2 + $0x38] sm:$0xff] (!%p1519_p2) }
 0x38b   : > { %v934_v63 = vadd.f32 %v914_v54, %v758_v5  ;;  %v925_v53 = vadd.f32 %v896_v23, %v749_v31  ;;  %v1170_v5 = vld [vmem:[%s2559_s28 + $0x10] sm:$0xff] (!%p1519_p2)  ;;  %v1153_v31 = vld [vmem:[%s2544_s11 + $0x8] sm:$0xff] (!%p1519_p2)  ;;  %v1155_v23 = vld [vmem:[%s2544_s11 + $0x18] sm:$0xff] (!%p1519_p2) }
 0x38c   : > { %v1186_v54 = vmul.f32 (!%p1519_p2), %v1170_v5, %v1154_v45  ;;  %1200 = vadd.xlane.f32.xlu0 (!%p1519_p2), %v1184_v21 }
 0x38d   : > { %951 = vst.msk [vmem:[#allocation3 + $0x58] sm:$0xff] %vm939_vm1, %v934_v63  ;;  %942 = vst.msk [vmem:[#allocation3 + $0x10] sm:$0xff] %vm939_vm1, %v925_v53  ;;  %v1185_v63 = vmul.f32 (!%p1519_p2), %v1169_v32, %v1153_v31  ;;  %v1187_v53 = vmul.f32 (!%p1519_p2), %v1171_v62, %v1155_v23  ;;  %v1015_v31 = vsub.f32 (!%p1519_p2), 0.0, %v3077_v30  ;;  %v3082_v32 = vld [vmem:[#allocation2 + $0x40] sm:$0xff] (!%p1519_p2)  ;;  %v3084_v23 = vld [vmem:[#allocation2 + $0x48] sm:$0xff] (!%p1519_p2) }
 0x38e   : > { %v912_v59 = vpop.xlane.xlu0 %911  ;;  %1204 = vadd.xlane.f32.xlu1 (!%p1519_p2), %v1186_v54 }
 0x38f   : > { %v933_v33 = vadd.f32 %v912_v59, %v757_v17  ;;  %v1157_v17 = vld [vmem:[%s2544_s11 + $0x28] sm:$0xff] (!%p1519_p2)  ;;  %v1188_v59 = vmul.f32 (!%p1519_p2), %v1172_v55, %v1156_v39  ;;  %v1017_v39 = vsub.f32 (!%p1519_p2), 0.0, %v3084_v23  ;;  %v3088_v55 = vld [vmem:[#allocation2 + $0x50] sm:$0xff] (!%p1519_p2) }
 0x390   : > { %1202 = vadd.xlane.f32.xlu0 (!%p1519_p2), %v1185_v63  ;;  %v1189_v38 = vmul.f32 (!%p1519_p2), %v1173_v35, %v1157_v17  ;;  %v1016_v63 = vsub.f32 (!%p1519_p2), 0.0, %v3082_v32  ;;  %v3091_v17 = vld [vmem:[#allocation2 + $0x58] sm:$0xff] (!%p1519_p2)  ;;  %v1018_v47 = vsub.f32 (!%p1519_p2), 0.0, %v3088_v55 }
 0x391   : > { %950 = vst.msk [vmem:[#allocation3 + $0x50] sm:$0xff] %vm939_vm1, %v933_v33  ;;  %v1159_v33 = vld [vmem:[%s2544_s11 + $0x38] sm:$0xff] (!%p1519_p2) }
 0x392   : > { %v902_v12 = vpop.xlane.xlu1 %901  ;;  %1206 = vadd.xlane.f32.xlu1 (!%p1519_p2), %v1187_v53  ;;  %v1191_v57 = vmul.f32 (!%p1519_p2), %v1175_v60, %v1159_v33  ;;  %v1038_v53 = vmul.f32 (!%p1519_p2), 1.442695, %v1015_v31  ;;  %v1042_v33 = vmul.f32 (!%p1519_p2), 1.442695, %v1017_v39  ;;  %v1019_v60 = vsub.f32 (!%p1519_p2), 0.0, %v3091_v17 }
 0x393   : > { %v928_v44 = vadd.f32 %v902_v12, %v752_v61  ;;  %v1160_v61 = vld [vmem:[%s2544_s11 + $0x40] sm:$0xff] (!%p1519_p2)  ;;  %v1161_v12 = vld [vmem:[%s2544_s11 + $0x48] sm:$0xff] (!%p1519_p2)  ;;  %v1044_v16 = vmul.f32 (!%p1519_p2), 1.442695, %v1018_v47 }
 0x394   : > { %1208 = vadd.xlane.f32.xlu0 (!%p1519_p2), %v1188_v59  ;;  %v1192_v58 = vmul.f32 (!%p1519_p2), %v1176_v10, %v1160_v61  ;;  %v1040_v59 = vmul.f32 (!%p1519_p2), 1.442695, %v1016_v63  ;;  %v3100_v61 = vld [vmem:[#allocation2 + $0x68] sm:$0xff] (!%p1519_p2)  ;;  %v992_v10 = vld [vmem:[#allocation3] sm:$0xff] (!%p1519_p2) }
 0x395   : > { %945 = vst.msk [vmem:[#allocation3 + $0x28] sm:$0xff] %vm939_vm1, %v928_v44  ;;  %v1193_v44 = vmul.f32 (!%p1519_p2), %v1177_v22, %v1161_v12 }
 0x396   : > { %v918_v11 = vpop.xlane.xlu1 %917  ;;  %v900_v34 = vpop.xlane.xlu0 %899  ;;  %1210 = vadd.xlane.f32.xlu1 (!%p1519_p2), %v1189_v38 }
 0x397   : > { %v936_v8 = vadd.f32 %v918_v11, %v760_v0  ;;  %v927_v15 = vadd.f32 %v900_v34, %v751_v14  ;;  %v1163_v0 = vld [vmem:[%s2544_s11 + $0x58] sm:$0xff] (!%p1519_p2)  ;;  %v1164_v34 = vld [vmem:[%s2544_s11 + $0x60] sm:$0xff] (!%p1519_p2) }
 0x398   : > { %1212 = vadd.xlane.f32.xlu0 (!%p1519_p2), %v1190_v1  ;;  %v1179_v14 = vld [vmem:[%s2559_s28 + $0x58] sm:$0xff] (!%p1519_p2)  ;;  %v3098_v1 = vld [vmem:[#allocation2 + $0x60] sm:$0xff] (!%p1519_p2) }
 0x399   : > { %953 = vst.msk [vmem:[#allocation3 + $0x68] sm:$0xff] %vm939_vm1, %v936_v8  ;;  %944 = vst.msk [vmem:[#allocation3 + $0x20] sm:$0xff] %vm939_vm1, %v927_v15  ;;  %v1195_v11 = vmul.f32 (!%p1519_p2), %v1179_v14, %v1163_v0  ;;  %v1165_v8 = vld [vmem:[%s2544_s11 + $0x68] sm:$0xff] (!%p1519_p2)  ;;  %v1020_v28 = vsub.f32 (!%p1519_p2), 0.0, %v3098_v1  ;;  %v1046_v14 = vmul.f32 (!%p1519_p2), 1.442695, %v1019_v60 }
 0x39a   : > { %v916_v41 = vpop.xlane.xlu0 %915  ;;  %1214 = vadd.xlane.f32.xlu1 (!%p1519_p2), %v1191_v57  ;;  %v1181_v15 = vld [vmem:[%s2559_s28 + $0x68] sm:$0xff] (!%p1519_p2) }
 0x39b   : > { %v935_v36 = vadd.f32 %v916_v41, %v759_v24  ;;  %v1196_v24 = vmul.f32 (!%p1519_p2), %v1180_v56, %v1164_v34  ;;  %v1197_v27 = vmul.f32 (!%p1519_p2), %v1181_v15, %v1165_v8  ;;  %v1166_v41 = vld [vmem:[%s2544_s11 + $0x70] sm:$0xff] (!%p1519_p2)  ;;  %v993_v0 = vld [vmem:[#allocation3 + $0x8] sm:$0xff] (!%p1519_p2) }
 0x39c   : > { %1216 = vadd.xlane.f32.xlu0 (!%p1519_p2), %v1192_v58  ;;  %v994_v58 = vld [vmem:[#allocation3 + $0x10] sm:$0xff] (!%p1519_p2) }
 0x39d   : > { %952 = vst.msk [vmem:[#allocation3 + $0x60] sm:$0xff] %vm939_vm1, %v935_v36  ;;  %v1167_v36 = vld [vmem:[%s2544_s11 + $0x78] sm:$0xff] (!%p1519_p2)  ;;  %v3106_v56 = vld [vmem:[#allocation2 + $0x70] sm:$0xff] (!%p1519_p2) }
 0x39e   : > { %v906_v2 = vpop.xlane.xlu1 %905  ;;  %1218 = vadd.xlane.f32.xlu1 (!%p1519_p2), %v1193_v44  ;;  %v1199_v52 = vmul.f32 (!%p1519_p2), %v1183_v6, %v1167_v36  ;;  %v1048_v36 = vmul.f32 (!%p1519_p2), 1.442695, %v1020_v28 }
 0x39f   : > { %v930_v26 = vadd.f32 %v906_v2, %v754_v7  ;;  %v1198_v7 = vmul.f32 (!%p1519_p2), %v1182_v19, %v1166_v41  ;;  %v3058_v2 = vld [vmem:[#allocation2] sm:$0xff] (!%p1519_p2)  ;;  %v995_v19 = vld [vmem:[#allocation3 + $0x18] sm:$0xff] (!%p1519_p2) }
 0x3a0   : > { %1220 = vadd.xlane.f32.xlu0 (!%p1519_p2), %v1194_v3  ;;  %v1021_v3 = vsub.f32 (!%p1519_p2), 0.0, %v3100_v61 }
 0x3a1   : > { %947 = vst.msk [vmem:[#allocation3 + $0x38] sm:$0xff] %vm939_vm1, %v930_v26  ;;  %v1008_v26 = vsub.f32 (!%p1519_p2), 0.0, %v3058_v2 }
 0x3a2   : > { %v922_v46 = vpop.xlane.xlu1 %921  ;;  %v904_v48 = vpop.xlane.xlu0 %903  ;;  %1222 = vadd.xlane.f32.xlu1 (!%p1519_p2), %v1195_v11 }
 0x3a3   : > { %v938_v25 = vadd.f32 %v922_v46, %v762_v37  ;;  %v929_v42 = vadd.f32 %v904_v48, %v753_v13  ;;  %975 = sbr.rel (%p1519_p2) target bundleno = 1294 (0x50e), region = 52  ;;  %v1010_v37 = vsub.f32 (!%p1519_p2), 0.0, %v3060_v9  ;;  %v1009_v13 = vsub.f32 (!%p1519_p2), 0.0, %v3062_v40  ;;  %v3069_v48 = vld [vmem:[#allocation2 + $0x20] sm:$0xff] (!%p1519_p2) }
 0x3a4   : > { %1224 = vadd.xlane.f32.xlu0 (!%p1519_p2), %v1196_v24  ;;  %v1024_v46 = vmul.f32 (!%p1519_p2), 1.442695, %v1008_v26  ;;  %v3108_v24 = vld [vmem:[#allocation2 + $0x78] sm:$0xff] (!%p1519_p2)  ;;  %v1022_v26 = vsub.f32 (!%p1519_p2), 0.0, %v3106_v56 }
 0x3a5   : > { %955 = vst.msk [vmem:[#allocation3 + $0x78] sm:$0xff] %vm939_vm1, %v938_v25  ;;  %946 = vst.msk [vmem:[#allocation3 + $0x30] sm:$0xff] %vm939_vm1, %v929_v42  ;;  %v1028_v20 = vmul.f32 (!%p1519_p2), 1.442695, %v1010_v37  ;;  %v1011_v25 = vsub.f32 (!%p1519_p2), 0.0, %v3067_v51 }
 0x3a6   : > { %v920_v29 = vpop.xlane.xlu0 %919  ;;  %1226 = vadd.xlane.f32.xlu1 (!%p1519_p2), %v1197_v27  ;;  %v1026_v42 = vmul.f32 (!%p1519_p2), 1.442695, %v1009_v13  ;;  %1875 = vpow2.f32 (!%p1519_p2), %v1024_v46  ;;  %v996_v46 = vld [vmem:[#allocation3 + $0x20] sm:$0xff] (!%p1519_p2)  ;;  %v1052_v63 = vmul.f32 (!%p1519_p2), 1.442695, %v1022_v26 }
 0x3a7   : > { %v937_v49 = vadd.f32 %v920_v29, %v761_v18  ;;  %v3072_v18 = vld [vmem:[#allocation2 + $0x28] sm:$0xff] (!%p1519_p2)  ;;  %v1012_v29 = vsub.f32 (!%p1519_p2), 0.0, %v3069_v48  ;;  %1877 = vpow2.f32 (!%p1519_p2), %v1028_v20  ;;  %v1030_v4 = vmul.f32 (!%p1519_p2), 1.442695, %v1011_v25 }
 0x3a8   : > { %1228 = vadd.xlane.f32.xlu0 (!%p1519_p2), %v1198_v7  ;;  %v1013_v45 = vsub.f32 (!%p1519_p2), 0.0, %v3072_v18  ;;  %1879 = vpow2.f32 (!%p1519_p2), %v1026_v42  ;;  %v1023_v20 = vsub.f32 (!%p1519_p2), 0.0, %v3108_v24 }
 0x3a9   : > { %954 = vst.msk [vmem:[#allocation3 + $0x70] sm:$0xff] %vm939_vm1, %v937_v49  ;;  %v3075_v49 = vld [vmem:[#allocation2 + $0x30] sm:$0xff] (!%p1519_p2)  ;;  %v1032_v5 = vmul.f32 (!%p1519_p2), 1.442695, %v1012_v29  ;;  %1881 = vpow2.f32 (!%p1519_p2), %v1030_v4 }
 0x3aa   : > { %1230 = vadd.xlane.f32.xlu1 %v1199_v52  ;;  %v1014_v21 = vsub.f32 0.0, %v3075_v49  ;;  %v1034_v54 = vmul.f32 1.442695, %v1013_v45  ;;  %v1050_v52 = vmul.f32 1.442695, %v1021_v3  ;;  %s3437_s23 = smov (!%p1232_p6, %s1236_s23), %s1235_s15  ;;  %v997_v45 = vld [vmem:[#allocation3 + $0x28] sm:$0xff] }
 0x3ab   : > { %1883 = vpow2.f32 %v1032_v5  ;;  %p1522_p7 = scmp.lt.s32.totalorder %s3437_s23, 0  ;;  %v1054_v39 = vmul.f32 1.442695, %v1023_v20  ;;  %s1242_s9 = sadd.s32 128, %s3437_s23 }
 0x3ac   : > { %v1036_v62 = vmul.f32 1.442695, %v1014_v21  ;;  %1885 = vpow2.f32 %v1034_v54  ;;  %v998_v54 = vld [vmem:[#allocation3 + $0x30] sm:$0xff] }
 0x3ad   : > { %s3439_s9 = smov (!%p1522_p7, %s1242_s9), %s3437_s23 }
 0x3ae   : > { %1887 = vpow2.f32 %v1036_v62 }
 0x3af   : > { %1889 = vpow2.f32 %v1038_v53  ;;  %v999_v53 = vld [vmem:[#allocation3 + $0x38] sm:$0xff] }
 0x3b0   : > { %v1876_v35 = vpop.eup %1875  ;;  %1891 = vpow2.f32 %v1040_v59 }
 0x3b1   : > { %v1878_v38 = vpop.eup %1877  ;;  %v1056_v57 = vmul.f32 240.0, %v1876_v35  ;;  %1893 = vpow2.f32 %v1042_v33 }
 0x3b2   : > { %v1880_v50 = vpop.eup %1879  ;;  %v1058_v12 = vmul.f32 240.0, %v1878_v38  ;;  %1895 = vpow2.f32 %v1044_v16 }
 0x3b3   : > { %v1882_v22 = vpop.eup %1881  ;;  %v1057_v44 = vmul.f32 240.0, %v1880_v50  ;;  %v1072_v34 = vsub.f32 %v992_v10, %v1056_v57  ;;  %1897 = vpow2.f32 %v1046_v14  ;;  %v1000_v57 = vld [vmem:[#allocation3 + $0x40] sm:$0xff] }
 0x3b4   : > { %v1074_v8 = vsub.f32 %v994_v58, %v1058_v12  ;;  %v1059_v15 = vmul.f32 240.0, %v1882_v22  ;;  %1899 = vpow2.f32 %v1048_v36 }
 0x3b5   : > { %v1884_v11 = vpop.eup %1883  ;;  %v1073_v41 = vsub.f32 %v993_v0, %v1057_v44  ;;  %v1088_v13 = vmax.f32 %v1072_v34, 1e-30  ;;  %1901 = vpow2.f32 %v1050_v52  ;;  %v1001_v44 = vld [vmem:[#allocation3 + $0x48] sm:$0xff] }
 0x3b6   : > { %v1886_v27 = vpop.eup %1885  ;;  %v1060_v7 = vmul.f32 240.0, %v1884_v11  ;;  %v1090_v25 = vmax.f32 %v1074_v8, 1e-30  ;;  %v1075_v42 = vsub.f32 %v995_v19, %v1059_v15  ;;  %v3121_v11 = vstv %s3439_s9  ;;  %v1002_v8 = vld [vmem:[#allocation3 + $0x50] sm:$0xff] }
 0x3b7   : > { %v1061_v29 = vmul.f32 240.0, %v1886_v27  ;;  %v1089_v4 = vmax.f32 %v1073_v41, 1e-30  ;;  %1903 = vlog2.f32 %v1088_v13  ;;  %v1003_v41 = vld [vmem:[#allocation3 + $0x58] sm:$0xff] }
 0x3b8   : > { %v1888_v6 = vpop.eup %1887  ;;  %v1076_v31 = vsub.f32 %v996_v46, %v1060_v7  ;;  %1905 = vlog2.f32 %v1090_v25  ;;  %v1091_v59 = vmax.f32 %v1075_v42, 1e-30  ;;  %v3125_v7 = vadd.s32 %v3121_v11, %v2633_v43  ;;  %v1004_v42 = vld [vmem:[#allocation3 + $0x60] sm:$0xff] }
 0x3b9   : > { %v1890_v37 = vpop.eup %1889  ;;  %v1062_v21 = vmul.f32 240.0, %v1888_v6  ;;  %v1077_v38 = vsub.f32 %v997_v45, %v1061_v29  ;;  %1907 = vlog2.f32 %v1089_v4  ;;  %v3393_v45 = vld [vmem:[#allocation29_spill] sm:$0xff] }
 0x3ba   : > { %v1892_v5 = vpop.eup %1891  ;;  %v1063_v62 = vmul.f32 240.0, %v1890_v37  ;;  %v1092_v33 = vmax.f32 %v1076_v31, 1e-30  ;;  %1909 = vpow2.f32 %v1052_v63  ;;  %vm1261_vm2 = vcmp.lt.s32.totalorder %v3125_v7, 8 }
 0x3bb   : > { %v1894_v35 = vpop.eup %1893  ;;  %v1078_v47 = vsub.f32 %v998_v54, %v1062_v21  ;;  %v1064_v50 = vmul.f32 240.0, %v1892_v5  ;;  %1911 = vpow2.f32 %v1054_v39  ;;  %v1093_v58 = vmax.f32 %v1077_v38, 1e-30  ;;  %v1005_v5 = vld [vmem:[#allocation3 + $0x68] sm:$0xff] }
 0x3bc   : > { %v1079_v60 = vsub.f32 %v999_v53, %v1063_v62  ;;  %v1896_v10 = vpop.eup %1895  ;;  %v1065_v12 = vmul.f32 240.0, %v1894_v35  ;;  %1913 = vlog2.f32 %v1091_v59  ;;  %v3129_v21 = vadd.s32 %v3121_v11, %v3393_v45 }
 0x3bd   : > { %v1898_v22 = vpop.eup %1897  ;;  %v1094_v16 = vmax.f32 %v1078_v47, 1e-30  ;;  %v1080_v28 = vsub.f32 %v1000_v57, %v1064_v50  ;;  %1915 = vlog2.f32 %v1092_v33  ;;  %v1066_v14 = vmul.f32 240.0, %v1896_v10  ;;  %v1006_v47 = vld [vmem:[#allocation3 + $0x70] sm:$0xff]  ;;  %v3394_v33 = vld [vmem:[#allocation24_spill] sm:$0xff]  ;;  %v3395_v57 = vld [vmem:[#allocation25_spill] sm:$0xff] }
 0x3be   : > { %v1095_v0 = vmax.f32 %v1079_v60, 1e-30  ;;  %v1900_v3 = vpop.eup %1899  ;;  %v1081_v34 = vsub.f32 %v1001_v44, %v1065_v12  ;;  %v1067_v15 = vmul.f32 240.0, %v1898_v22  ;;  %1917 = vlog2.f32 %v1093_v58  ;;  %v1007_v22 = vld [vmem:[#allocation3 + $0x78] sm:$0xff] }
 0x3bf   : > { %v1902_v27 = vpop.eup %1901  ;;  %1919 = vlog2.f32 %v1094_v16  ;;  %v1096_v36 = vmax.f32 %v1080_v28, 1e-30  ;;  %v1082_v52 = vsub.f32 %v1002_v8, %v1066_v14  ;;  %v1068_v46 = vmul.f32 240.0, %v1900_v3  ;;  %v3396_v16 = vld [vmem:[#allocation31_spill] sm:$0xff]  ;;  %v3397_v28 = vld [vmem:[#allocation30_spill] sm:$0xff] }
 0x3c0   : > { %1921 = vlog2.f32 %v1095_v0  ;;  %v1097_v37 = vmax.f32 %v1081_v34, 1e-30  ;;  %v1083_v13 = vsub.f32 %v1003_v41, %v1067_v15  ;;  %v1069_v29 = vmul.f32 240.0, %v1902_v27 }
 0x3c1   : > { %v1904_v19 = vpop.eup %1903  ;;  %1923 = vlog2.f32 %v1096_v36  ;;  %v1098_v54 = vmax.f32 %v1082_v52, 1e-30  ;;  %v1084_v63 = vsub.f32 %v1004_v42, %v1068_v46  ;;  %vm1263_vm3 = vcmp.lt.s32.totalorder %v3129_v21, 8 }
 0x3c2   : > { %v1906_v6 = vpop.eup %1905  ;;  %v1105_v25 = vmul.f32 0.6931472, %v1904_v19  ;;  %1925 = vlog2.f32 %v1097_v37  ;;  %v1099_v62 = vmax.f32 %v1083_v13, 1e-30  ;;  %v1085_v38 = vsub.f32 %v1005_v5, %v1069_v29 }
 0x3c3   : > { %v1908_v26 = vpop.eup %1907  ;;  %v1109_v43 = vmul.f32 0.6931472, %v1906_v6  ;;  %v1246_v60 = vadd.s32 %v3121_v11, %v3394_v33  ;;  %v1248_v10 = vadd.s32 %v3121_v11, %v3395_v57  ;;  %v3143_v0 = vadd.s32 %v3121_v11, %v3397_v28  ;;  %v3400_v28 = vld [vmem:[#allocation27_spill] sm:$0xff] }
 0x3c4   : > { %v1910_v20 = vpop.eup %1909  ;;  %v1136_v35 = vadd.f32 %v1105_v25, %v3058_v2  ;;  %v1107_v59 = vmul.f32 0.6931472, %v1908_v26  ;;  %v1249_v2 = vadd.s32 %v3121_v11, %v3396_v16  ;;  %1927 = vlog2.f32 %v1098_v54  ;;  %v3398_v54 = vld [vmem:[#allocation35_spill] sm:$0xff] }
 0x3c5   : > { %v1912_v4 = vpop.eup %1911  ;;  %v1070_v53 = vmul.f32 240.0, %v1910_v20  ;;  %v1138_v44 = vadd.f32 %v1109_v43, %v3060_v9  ;;  %1929 = vlog2.f32 %v1099_v62  ;;  %v1100_v8 = vmax.f32 %v1084_v63, 1e-30  ;;  %v3399_v63 = vld [vmem:[#allocation34_spill] sm:$0xff] }
 0x3c6   : > { %v1914_v31 = vpop.eup %1913  ;;  %v1071_v50 = vmul.f32 240.0, %v1912_v4  ;;  %v1137_v36 = vadd.f32 %v1107_v59, %v3062_v40  ;;  %v1101_v9 = vmax.f32 %v1085_v38, 1e-30  ;;  %vm1262_vm4 = vcmp.lt.s32.totalorder %v1246_v60, 8 }
 0x3c7   : > { %v1916_v39 = vpop.eup %1915  ;;  %v1111_v12 = vmul.f32 0.6931472, %v1914_v31  ;;  %v1086_v15 = vsub.f32 %v1006_v47, %v1070_v53  ;;  %vm1264_vm5 = vcmp.lt.s32.totalorder %v1248_v10, 8  ;;  %vm1265_vm6 = vcmp.lt.s32.totalorder %v1249_v2, 8 }
 0x3c8   : > { %v1918_v58 = vpop.eup %1917  ;;  %v1113_v34 = vmul.f32 0.6931472, %v1916_v39  ;;  %v1087_v6 = vsub.f32 %v1007_v22, %v1071_v50  ;;  %vm1266_vm7 = vcmp.lt.s32.totalorder %v3143_v0, 8  ;;  %1931 = vlog2.f32 %v1100_v8  ;;  %v3401_v8 = vld [vmem:[#allocation23_spill] sm:$0xff] }
 0x3c9   : > { %v1920_v14 = vpop.eup %1919  ;;  %v1139_v52 = vadd.f32 %v1111_v12, %v3067_v51  ;;  %v1115_v26 = vmul.f32 0.6931472, %v1918_v58  ;;  %v1102_v29 = vmax.f32 %v1086_v15, 1e-30  ;;  %1933 = vlog2.f32 %v1101_v9 }
 0x3ca   : > { %v1922_v27 = vpop.eup %1921  ;;  %v1117_v13 = vmul.f32 0.6931472, %v1920_v14  ;;  %v1140_v25 = vadd.f32 %v1113_v34, %v3069_v48  ;;  %v1103_v51 = vmax.f32 %v1087_v6, 1e-30  ;;  %v1251_v62 = vadd.s32 %v3121_v11, %v3398_v54 }
 0x3cb   : > { %v1924_v46 = vpop.eup %1923  ;;  %v1119_v42 = vmul.f32 0.6931472, %v1922_v27  ;;  %v1141_v43 = vadd.f32 %v1115_v26, %v3072_v18  ;;  %v1252_v48 = vadd.s32 %v3121_v11, %v3399_v63  ;;  %1935 = vlog2.f32 %v1102_v29 }
 0x3cc   : > { %v1926_v5 = vpop.eup %1925  ;;  %v1142_v39 = vadd.f32 %v1117_v13, %v3075_v49  ;;  %1937 = vlog2.f32 %v1103_v51  ;;  %vm1267_vm8 = vcmp.lt.s32.totalorder %v1251_v62, 8  ;;  %v1253_v14 = vadd.s32 %v3121_v11, %v3400_v28 }
 0x3cd   : > { %v1143_v21 = vadd.f32 %v1119_v42, %v3077_v30  ;;  %vm1268_vm9 = vcmp.lt.s32.totalorder %v1252_v48, 8  ;;  %v1254_v15 = vadd.s32 %v3121_v11, %v3401_v8 }
 0x3ce   : > { %v1928_v50 = vpop.eup %1927  ;;  %vm1269_vm10 = vcmp.lt.s32.totalorder %v1253_v14, 8 }
 0x3cf   : > { %v1930_v60 = vpop.eup %1929  ;;  %vm1270_vm11 = vcmp.lt.s32.totalorder %v1254_v15, 8 }
 0x3d2   : > { %v1932_v9 = vpop.eup %1931 }
 0x3d3   : > { %v1934_v0 = vpop.eup %1933 }
 0x419   : > { %v1201_v3 = vpop.xlane.xlu0 %1200 }
 0x41a   : > { %v1277_v41 = vsub.f32 %v1136_v35, %v1201_v3  ;;  %v1121_v35 = vmul.f32 0.6931472, %v1924_v46 }
 0x41b   : > { %v1205_v19 = vpop.xlane.xlu1 %1204 }
 0x41c   : > { %v1279_v37 = vsub.f32 %v1138_v44, %v1205_v19  ;;  %v1293_v40 = vsel %vm1261_vm2, %v1277_v41, 0.0  ;;  %v1123_v44 = vmul.f32 0.6931472, %v1926_v5  ;;  %v1144_v2 = vadd.f32 %v1121_v35, %v3082_v32  ;;  %v3404_v35 = vld [vmem:[#allocation33_spill] sm:$0xff] }
 0x41d   : > { %v1203_v20 = vpop.xlane.xlu0 %1202  ;;  %v1309_v59 = vsel %vm939_vm1, %v1293_v40, 0.0  ;;  %v3403_v40 = vld [vmem:[#allocation26_spill] sm:$0xff] }
 0x41e   : > { %v1278_v4 = vsub.f32 %v1137_v36, %v1203_v20  ;;  %v1295_v53 = vsel %vm1263_vm3, %v1279_v37, 0.0  ;;  %v1125_v36 = vmul.f32 0.6931472, %v1928_v50  ;;  %v1145_v26 = vadd.f32 %v1123_v44, %v3084_v23  ;;  %v3402_v20 = vld [vmem:[#allocation28_spill] sm:$0xff] }
 0x41f   : > { %v1207_v45 = vpop.xlane.xlu1 %1206  ;;  %v1312_v22 = vsel %vm939_vm1, %v1295_v53, 0.0  ;;  %v1127_v37 = vmul.f32 0.6931472, %v1930_v60  ;;  %v1131_v53 = vmul.f32 0.6931472, %v1934_v0 }
 0x420   : > { %v1280_v31 = vsub.f32 %v1139_v52, %v1207_v45  ;;  %v1294_v7 = vsel %vm1262_vm4, %v1278_v4, 0.0  ;;  %v1256_v4 = vadd.s32 %v3121_v11, %v3403_v40  ;;  %v1146_v5 = vadd.f32 %v1125_v36, %v3088_v55 }
 0x421   : > { %v1310_v38 = vsel %vm939_vm1, %v1294_v7, 0.0  ;;  %v1209_v47 = vpop.xlane.xlu0 %1208  ;;  %v1147_v63 = vadd.f32 %v1127_v37, %v3091_v17 }
 0x422   : > { %v1296_v18 = vsel %vm1264_vm5, %v1280_v31, 0.0  ;;  %v1311_v33 = vadd.f32 %v1310_v38, %v1309_v59  ;;  %v1281_v57 = vsub.f32 %v1140_v25, %v1209_v47  ;;  %v1255_v25 = vadd.s32 %v3121_v11, %v3402_v20  ;;  %v3405_v47 = vld [vmem:[#allocation32_spill] sm:$0xff] }
 0x423   : > { %v1211_v12 = vpop.xlane.xlu1 %1210  ;;  %v1314_v49 = vsel %vm939_vm1, %v1296_v18, 0.0  ;;  %v1129_v31 = vmul.f32 0.6931472, %v1932_v9  ;;  %v1257_v59 = vadd.s32 %v3121_v11, %v3404_v35  ;;  %vm1272_vm13 = vcmp.lt.s32.totalorder %v1256_v4, 8 }
 0x424   : > { %v1282_v58 = vsub.f32 %v1141_v43, %v1211_v12  ;;  %v1313_v16 = vadd.f32 %v1312_v22, %v1311_v33  ;;  %v1297_v10 = vsel %vm1265_vm6, %v1281_v57, 0.0  ;;  %v1936_v43 = vpop.eup %1935  ;;  %vm1271_vm12 = vcmp.lt.s32.totalorder %v1255_v25, 8 }
 0x425   : > { %v1316_v3 = vsel %vm939_vm1, %v1297_v10, 0.0  ;;  %v1213_v34 = vpop.xlane.xlu0 %1212  ;;  %v1938_v48 = vpop.eup %1937  ;;  %v1258_v50 = vadd.s32 %v3121_v11, %v3405_v47  ;;  %v1148_v12 = vadd.f32 %v1129_v31, %v3098_v1  ;;  %vm1273_vm14 = vcmp.lt.s32.totalorder %v1257_v59, 8 }
 0x426   : > { %v1298_v30 = vsel %vm1266_vm7, %v1282_v58, 0.0  ;;  %v1315_v27 = vadd.f32 %v1314_v49, %v1313_v16  ;;  %v1283_v41 = vsub.f32 %v1142_v39, %v1213_v34  ;;  %v1149_v49 = vadd.f32 %v1131_v53, %v3100_v61 }
 0x427   : > { %v1215_v19 = vpop.xlane.xlu1 %1214  ;;  %v1318_v6 = vsel %vm939_vm1, %v1298_v30, 0.0  ;;  %v1135_v58 = vmul.f32 0.6931472, %v1938_v48  ;;  %vm1274_vm15 = vcmp.lt.s32.totalorder %v1258_v50, 8 }
 0x428   : > { %v1284_v52 = vsub.f32 %v1143_v21, %v1215_v19  ;;  %v1317_v13 = vadd.f32 %v1316_v3, %v1315_v27  ;;  %v1299_v46 = vsel %vm1267_vm8, %v1283_v41, 0.0  ;;  %v1133_v21 = vmul.f32 0.6931472, %v1936_v43  ;;  %v3406_v3 = vld [vmem:[#allocation37_spill] sm:$0xff]  ;;  %v3407_v27 = vld [vmem:[#allocation36_spill] sm:$0xff] }
 0x429   : > { %v1320_v42 = vsel %vm939_vm1, %v1299_v46, 0.0  ;;  %v1217_v29 = vpop.xlane.xlu0 %1216  ;;  %v1259_v30 = vadd.s32 %v3121_v11, %v3406_v3  ;;  %v1260_v61 = vadd.s32 %v3121_v11, %v3407_v27 }
 0x42a   : > { %v1300_v32 = vsel %vm1268_vm9, %v1284_v52, 0.0  ;;  %v1319_v45 = vadd.f32 %v1318_v6, %v1317_v13  ;;  %v1285_v23 = vsub.f32 %v1144_v2, %v1217_v29  ;;  %v1150_v15 = vadd.f32 %v1133_v21, %v3106_v56 }
 0x42b   : > { %v1219_v51 = vpop.xlane.xlu1 %1218  ;;  %v1322_v54 = vsel %vm939_vm1, %v1300_v32, 0.0  ;;  %v1151_v2 = vadd.f32 %v1135_v58, %v3108_v24  ;;  %vm1275_vm0 = vcmp.lt.s32.totalorder %v1259_v30, 8  ;;  %vm1276_vm2 = vcmp.lt.s32.totalorder %v1260_v61, 8 }
 0x42c   : > { %v1286_v62 = vsub.f32 %v1145_v26, %v1219_v51  ;;  %v1321_v7 = vadd.f32 %v1320_v42, %v1319_v45  ;;  %v1301_v39 = vsel %vm1269_vm10, %v1285_v23, 0.0 }
 0x42d   : > { %v1324_v38 = vsel %vm939_vm1, %v1301_v39, 0.0  ;;  %v1221_v18 = vpop.xlane.xlu0 %1220 }
 0x42e   : > { %v1302_v55 = vsel %vm1270_vm11, %v1286_v62, 0.0  ;;  %v1323_v33 = vadd.f32 %v1322_v54, %v1321_v7  ;;  %v1287_v17 = vsub.f32 %v1146_v5, %v1221_v18 }
 0x42f   : > { %v1223_v57 = vpop.xlane.xlu1 %1222  ;;  %v1326_v60 = vsel %vm939_vm1, %v1302_v55, 0.0 }
 0x430   : > { %v1288_v22 = vsub.f32 %v1147_v63, %v1223_v57  ;;  %v1325_v44 = vadd.f32 %v1324_v38, %v1323_v33  ;;  %v1303_v16 = vsel %vm1271_vm12, %v1287_v17, 0.0 }
 0x431   : > { %v1328_v10 = vsel %vm939_vm1, %v1303_v16, 0.0  ;;  %v1225_v14 = vpop.xlane.xlu0 %1224 }
 0x432   : > { %v1304_v28 = vsel %vm1272_vm13, %v1288_v22, 0.0  ;;  %v1327_v1 = vadd.f32 %v1326_v60, %v1325_v44  ;;  %v1289_v34 = vsub.f32 %v1148_v12, %v1225_v14 }
 0x433   : > { %v1227_v8 = vpop.xlane.xlu1 %1226  ;;  %v1330_v41 = vsel %vm939_vm1, %v1304_v28, 0.0 }
 0x434   : > { %v1290_v19 = vsub.f32 %v1149_v49, %v1227_v8  ;;  %v1329_v36 = vadd.f32 %v1328_v10, %v1327_v1  ;;  %v1305_v9 = vsel %vm1273_vm14, %v1289_v34, 0.0 }
 0x435   : > { %v1332_v6 = vsel %vm939_vm1, %v1305_v9, 0.0  ;;  %v1229_v26 = vpop.xlane.xlu0 %1228 }
 0x436   : > { %v1306_v52 = vsel %vm1274_vm15, %v1290_v19, 0.0  ;;  %v1331_v37 = vadd.f32 %v1330_v41, %v1329_v36  ;;  %v1291_v0 = vsub.f32 %v1150_v15, %v1229_v26 }
 0x437   : > { %v1231_v13 = vpop.xlane.xlu1 %1230  ;;  %v1334_v56 = vsel %vm939_vm1, %v1306_v52, 0.0 }
 0x438   : > { %v1292_v46 = vsub.f32 %v1151_v2, %v1231_v13  ;;  %v1333_v11 = vadd.f32 %v1332_v6, %v1331_v37  ;;  %v1307_v20 = vsel %vm1275_vm0, %v1291_v0, 0.0 }
 0x439   : > { %v1336_v25 = vsel %vm939_vm1, %v1307_v20, 0.0 }
 0x43a   : > { %v1308_v42 = vsel %vm1276_vm2, %v1292_v46, 0.0  ;;  %v1335_v24 = vadd.f32 %v1334_v56, %v1333_v11 }
 0x43b   : > { %v1338_v32 = vsel %vm939_vm1, %v1308_v42, 0.0 }
 0x43c   : > { %v1337_v29 = vadd.f32 %v1336_v25, %v1335_v24 }
 0x43e   : > { %v1339_v40 = vadd.f32 %v1338_v32, %v1337_v29 }
 0x440   : > { %1340 = vadd.xlane.f32.xlu0 %v1339_v40 }
 0x4cd   : > { %v1341_v4 = vpop.xlane.xlu0 %1340 }
 0x4ce   : > { %v1342_v45 = vrot.slane %v1341_v4, 4 }
 0x4d0   : > { %v1343_v23 = vadd.f32 %v1342_v45, %v1341_v4 }
 0x4d2   : > { %v1344_v51 = vrot.slane %v1343_v23, 2 }
 0x4d4   : > { %v1345_v5 = vadd.f32 %v1344_v51, %v1343_v23 }
 0x4d6   : > { %v1346_v31 = vrot.slane %v1345_v5, 1 }
 0x4d8   : > { %v1347_v43 = vadd.f32 %v1346_v31, %v1345_v5 }
 0x4da   : > { %1666 = vpush %v1347_v43 }
 0x50b   : > { %s1667_s11 = spop %1666 }
 0x50c   : > { %v1349_v54 = vstv %s1667_s11 }
 0x50d   : > { %1350 = vst [vmem:[%s2566_s6] sm:$0xff] %v1349_v54 }
 0x50e PF: > { %s3408_s5 = sld [smem:[#allocation40_spill]]  ;;  %s1365_s3 = sshll.u32 %s2566_s6, 4  ;;  %s1366_s3 = int_to_ptr.vmem [resolvable:$true] %s1365_s3 }
 0x50f   : > { %s1352_s10 = scalar_lea.sflag [#allocation6], %s2540_s17  ;;  %s2029_s29 = scalar_lea.vmem %s1366_s3, 128 }
 0x510   : > { %p2030_p11 = scmp.ne.s32.totalorder %s1366_s3, %s2029_s29  ;;  %p3409_p10 = scmp.ne.s32.totalorder %s3346_s22, 0 }
 0x511   : > { %s2193_s28 = smov [#allocation10]  }
 0x512   : > { %p2031_p3 = pnand %p2030_p11, %p3409_p10  ;;  %s2033_s26 = sshll.u32 %s2193_s28, 4  ;;  %s2034_s26 = int_to_ptr.vmem [resolvable:$false] %s2033_s26 }
 0x513   : > { %s2035_s4 = scalar_lea.vmem %s2034_s26, 256  ;;  %p2036_p1 = scmp.lt.s32.totalorder %s1366_s3, %s2034_s26 }
 0x514   : > { %s3215_s27 = scalar_lea.hbm %s3408_s5, %s2636_s24  ;;  %p2032_p12 = pneg %p2031_p3 }
 0x515   : > { %p2037_p13 = scmp.lt.s32.totalorder %s2035_s4, %s2029_s29 }
 0x517   : > { %p2038_p0 = por %p2037_p13, %p2036_p1 }
 0x519   : > { %p2039_p9 = pnand %p2038_p0, %p2032_p12 }
 0x51b   : > { %2042 = shalt.err (!%p2039_p9)
}
 0x51c   : > { %s2043_s17 = scalar_lea.hbm %s3215_s27, 128  ;;  %s2047_s12 = scalar_lea.hbm %s3408_s5, 256 }
 0x51d   : > { %p2044_p8 = scmp.ne.s32.totalorder %s3215_s27, %s2043_s17  ;;  %p2048_p2 = scmp.lt.u32.totalorder %s3215_s27, %s3408_s5 }
 0x51e   : > { %p2049_p6 = scmp.lt.u32.totalorder %s2047_s12, %s2043_s17  ;;  %p2051_p11 = scmp.lt.u32.totalorder %s2043_s17, %s3215_s27 }
 0x51f   : > { %p2045_p4 = pnand %p2044_p8, %p3409_p10 }
 0x520   : > { %p2050_p7 = por %p2049_p6, %p2048_p2 }
 0x521   : > { %p2046_p5 = pneg %p2045_p4 }
 0x522   : > { %p2052_p3 = por %p2051_p11, %p2050_p7 }
 0x524   : > { %p2053_p12 = pnand %p2052_p3, %p2046_p5 }
 0x526   : > { %2056 = shalt.err (!%p2053_p12)
}
 0x527   : > { %1674 = dma.vmem_to_hbm [thread:$0]  (%p3409_p10), %s1366_s3, 128, %s3215_s27, %s1352_s10  }
 0x528 PF: > { %p1691_p1 = scmp.ge.s32.totalorder %s2183_s25, 2  ;;  %s1377_s15 = sand.u32 1, %s2155_s18  }
 0x529   : > { %p3410_p13 = scmp.ne.s32.totalorder %s3347_s8, 0  ;;  %s1378_s23 = scalar_lea.sflag [#allocation6], %s1377_s15 }
 0x52b   : > { %p1687_p0 = pnand %p1691_p1, %p3410_p13 }
 0x52d   : > { %2126 = dma.done.wait (!%p1687_p0), %s1378_s23, 128  }
 0x52e   : > { %2128 = vsyncadd (!%p1687_p0), %s1378_s23, 4294967168  ;;  %s22_s25 = sadd.s32 1, %s2183_s25   ;;  %s3412_s22 = sld [smem:[#allocation15_spill]] }
 0x52f   : > { %p3241_p9 = scmp.ge.s32.totalorder %s22_s25, 6   ;;  %s3413_s17 = sld [smem:[#allocation20_spill]] }
 0x530   : > { %s3414_s11 = sld [smem:[#allocation22_spill]]  ;;  %s3415_s21 = sld [smem:[#allocation17_spill]] }
 0x531   : > { %s3416_s8 = sld [smem:[#allocation18_spill]]  ;;  %s3417_s23 = sld [smem:[#allocation19_spill]] }
 0x532   : > { %s3418_s24 = sld [smem:[#allocation21_spill]]  ;;  %s3419_s12 = smov %s2135_s13 }
 0x533   : > { %s3420_s13 = smov %s2139_s14  ;;  %s3421_s14 = smov %s2493_s1 }
 0x534   : > { %s3422_s15 = smov %s2147_s16  ;;  %s3423_s16 = smov %s3412_s22 }
 0x535   : > { %s3424_s18 = smov %s2159_s19  ;;  %s3425_s19 = smov %s2163_s20 }
 0x536   : > { %s3426_s20 = smov %s3414_s11  ;;  %21 = sbr.rel (!%p3241_p9) target bundleno = 16 (0x10), region = 109 }
 0x537   : > { %s3427_s22 = smov %s3416_s8 }
 0x53d   :  { %1383 = vsyncpa [#allocation5], 1 }
 0x53e   :  { %1385 = vsyncpa [#allocation5 + $0x1], 1 }
 0x53f   :  { %1386 = vsyncpa [#allocation8], 1 }
 0x540   :  { %1388 = vsyncpa [#allocation8 + $0x1], 1 }
 0x541   :  { %1389 = vsyncpa [#allocation6], 1 }
 0x542   :  { %1391 = vsyncpa [#allocation6 + $0x1], 1 }

</bundles_post_ra>
